<compile_context>
chip_gen: v5e
topology: v5e:2x2
jax: 0.10.0
libtpu: 0.0.40
codegen_flags: <defaults>
</compile_context>

<pallas_src>
import functools

import jax
import jax.numpy as jnp
from jax.experimental import pallas as pl
from jax.experimental.pallas import tpu as pltpu


def _make_fused_kernel(num_layers, T, B, H, O):
    """Build the fused (wavefronted) LSTM-stack + final-fc kernel."""

    def kernel(*refs):
        # refs = [x_flat,
        #         wih0, whh0, b0,
        #         (wcat_l, b_l) for l in 1..num_layers-1,
        #         fc_w, fc_b, out]
        pos = 0
        x_ref = refs[pos]; pos += 1
        wih0_ref, whh0_ref, b0_ref = refs[pos], refs[pos + 1], refs[pos + 2]
        pos += 3
        wcat_refs, bias_refs = [], []
        for _ in range(1, num_layers):
            wcat_refs.append(refs[pos]); bias_refs.append(refs[pos + 1])
            pos += 2
        fcw_ref, fcb_ref = refs[pos], refs[pos + 1]
        out_ref = refs[pos + 2]

        # Layer-0 non-recurrent projection + bias for the whole sequence:
        # one big (T*B, D) @ (D, 4H) bf16 MXU matmul, off the serial chain.
        gx0 = (
            jnp.dot(x_ref[...], wih0_ref[...], preferred_element_type=jnp.float32)
            + b0_ref[...]
        )                                                   # (T*B, 4H) f32

        whh0 = whh0_ref[...]                                # (H, 4H) bf16
        wcats = [w[...] for w in wcat_refs]                 # (2H, 4H) bf16 each
        biases = [b[...] for b in bias_refs]                # (1, 4H) f32 each

        h = [jnp.zeros((B, H), jnp.float32) for _ in range(num_layers)]
        c = [jnp.zeros((B, H), jnp.float32) for _ in range(num_layers)]

        def lstm_cell(gates, c_prev):
            # Full-vreg nonlinearities: one sigmoid + one tanh EUP pass,
            # individual gates sliced afterwards (PyTorch order i, f, g, o).
            sig = jax.nn.sigmoid(gates)
            th = jnp.tanh(gates)
            i_g = sig[:, 0 * H:1 * H]
            f_g = sig[:, 1 * H:2 * H]
            g_g = th[:, 2 * H:3 * H]
            o_g = sig[:, 3 * H:4 * H]
            c_new = f_g * c_prev + i_g * g_g
            h_new = o_g * jnp.tanh(c_new)
            return h_new, c_new

        # Wavefront schedule: at wave w, layer l processes timestep t = w - l.
        # Layer l step t only depends on layer l-1 step t (same wave - 1), so
        # the unrolled trace exposes T + L - 1 dependent steps to the scheduler.
        for w in range(T + num_layers - 1):
            prev_h = list(h)            # SSA snapshot of end-of-wave-(w-1) state
            for l in range(num_layers):
                t = w - l
                if t < 0 or t >= T:
                    continue
                if l == 0:
                    gates = gx0[t * B:(t + 1) * B, :] + jnp.dot(
                        prev_h[0].astype(jnp.bfloat16), whh0,
                        preferred_element_type=jnp.float32)             # (B, 4H)
                else:
                    # Fused input + recurrent projection: one MXU push/pop.
                    inp = jnp.concatenate(
                        [prev_h[l - 1], prev_h[l]], axis=-1
                    ).astype(jnp.bfloat16)                              # (B, 2H)
                    gates = jnp.dot(
                        inp, wcats[l - 1], preferred_element_type=jnp.float32
                    ) + biases[l - 1]                                   # (B, 4H)
                h_new, c_new = lstm_cell(gates, c[l])
                h[l] = h_new
                c[l] = c_new
        # TODO(synk): nn.LSTM inter-layer dropout(p=0.2) is train-only; this
        # implements eval-mode semantics (no dropout).

        h_last = h[num_layers - 1]      # h_{T-1} of the top layer, (B, H) f32

        # Final-timestep fc (only t = T-1 feeds the downstream select).
        if O == 1:
            # N=1 MXU matmul is pure drain latency -> VALU multiply + XLU reduce.
            out_ref[...] = (
                jnp.sum(h_last * fcw_ref[...], axis=-1, keepdims=True)
                + fcb_ref[...]
            )
        else:
            out_ref[...] = (
                jnp.dot(h_last, fcw_ref[...], preferred_element_type=jnp.float32)
                + fcb_ref[...]
            )

    return kernel


def _fused_logits(x, params, num_layers):
    """Run the fused Pallas kernel; returns fc logits at t = T-1, shape (B, O)."""
    T, B, D = x.shape
    H = params["w_hh_t_0"].shape[0]
    O = params["fc_w_t"].shape[1]

    # bf16 MXU inputs prepared at the pallas_call boundary (f32 accumulate in
    # kernel); biases and fc stay f32.
    inputs = [x.reshape(T * B, D).astype(jnp.bfloat16)]
    inputs += [params["w_ih_t_0"].astype(jnp.bfloat16),
               params["w_hh_t_0"].astype(jnp.bfloat16),
               params["b_0"]]
    for layer in range(1, num_layers):
        w_cat = jnp.concatenate(
            [params[f"w_ih_t_{layer}"], params[f"w_hh_t_{layer}"]], axis=0
        )                                                   # (2H, 4H)
        inputs += [w_cat.astype(jnp.bfloat16), params[f"b_{layer}"]]
    if O == 1:
        inputs += [params["fc_w_t"].reshape(1, H), params["fc_b"]]   # row vector
    else:
        inputs += [params["fc_w_t"], params["fc_b"]]

    return pl.pallas_call(
        _make_fused_kernel(num_layers, T, B, H, O),
        out_shape=jax.ShapeDtypeStruct((B, O), jnp.float32),
        in_specs=[pl.BlockSpec(memory_space=pltpu.MemorySpace.VMEM)
                  for _ in inputs],
        out_specs=pl.BlockSpec(memory_space=pltpu.MemorySpace.VMEM),
    )(*inputs)


@functools.partial(jax.jit, static_argnames=("num_layers",))
def lstm_stack_logits(x, params, num_layers):
    return _fused_logits(x, params, num_layers)


@functools.partial(jax.jit, static_argnames=("num_layers",))
def lstm_module_forward(x, params, num_layers):
    """Equivalent of LSTM_Module.forward (eval mode). x: (T, B, D) -> (B,)."""
    logits = _fused_logits(x, params, num_layers)        # (B, O)
    probs = jax.nn.softmax(logits, axis=-1)              # softmax over output_dim
    return probs[:, 0]                                    # == out.permute(1,0,2)[:, -1, 0]


def init_params(key, input_dim, hidden_dim, num_layers, output_dim):
    """Deterministic init mimicking PyTorch's uniform(-1/sqrt(H), 1/sqrt(H))."""
    params = {}
    bound = 1.0 / jnp.sqrt(jnp.float32(hidden_dim))
    for layer in range(num_layers):
        d_in = input_dim if layer == 0 else hidden_dim
        key, k1, k2, k3, k4 = jax.random.split(key, 5)
        w_ih = jax.random.uniform(k1, (4 * hidden_dim, d_in), jnp.float32, -bound, bound)
        w_hh = jax.random.uniform(k2, (4 * hidden_dim, hidden_dim), jnp.float32, -bound, bound)
        b_ih = jax.random.uniform(k3, (4 * hidden_dim,), jnp.float32, -bound, bound)
        b_hh = jax.random.uniform(k4, (4 * hidden_dim,), jnp.float32, -bound, bound)
        params[f"w_ih_t_{layer}"] = w_ih.T                     # (Din, 4H)
        params[f"w_hh_t_{layer}"] = w_hh.T                     # (H, 4H)
        params[f"b_{layer}"] = (b_ih + b_hh)[None, :]          # (1, 4H)
    key, kf1, kf2 = jax.random.split(key, 3)
    fc_bound = 1.0 / jnp.sqrt(jnp.float32(hidden_dim))
    params["fc_w_t"] = jax.random.uniform(kf1, (output_dim, hidden_dim), jnp.float32,
                                          -fc_bound, fc_bound).T        # (H, O)
    params["fc_b"] = jax.random.uniform(kf2, (output_dim,), jnp.float32,
                                        -fc_bound, fc_bound)[None, :]   # (1, O)
    return params


def _reference_lstm_layer(x, w_ih_t, w_hh_t, bias):
    """Pure-JAX f32 reference for one LSTM layer (lax.scan), for sanity checking."""
    T, B, _ = x.shape
    H = w_hh_t.shape[0]

    def step(carry, x_t):
        h, c = carry
        gates = x_t @ w_ih_t + h @ w_hh_t + bias
        i = jax.nn.sigmoid(gates[:, 0 * H:1 * H])
        f = jax.nn.sigmoid(gates[:, 1 * H:2 * H])
        g = jnp.tanh(gates[:, 2 * H:3 * H])
        o = jax.nn.sigmoid(gates[:, 3 * H:4 * H])
        c_new = f * c + i * g
        h_new = o * jnp.tanh(c_new)
        return (h_new, c_new), h_new

    init = (jnp.zeros((B, H), jnp.float32), jnp.zeros((B, H), jnp.float32))
    _, hs = jax.lax.scan(step, init, x)
    return hs


if __name__ == "__main__":
    # Small shapes consistent with the module: seq=8, batch=8, input_dim=16,
    # hidden_dim=32, num_layers=2, output_dim=1.
    T, B, D, H, L, O = 8, 8, 16, 32, 2, 1

    key = jax.random.PRNGKey(0)
    key, kx = jax.random.split(key)
    x = jax.random.normal(kx, (T, B, D), jnp.float32)

    params = init_params(key, D, H, L, O)

    # Full module forward (softmax over output_dim=1 is degenerate -> ones,
    # faithfully replicating the PyTorch module).
    out = lstm_module_forward(x, params, num_layers=L)
    out = jax.block_until_ready(out)
    assert out.shape == (B,), out.shape

    # Meaningful sanity check: fused-kernel fc logits vs a pure-JAX f32
    # lax.scan LSTM stack + fc.  Kernel matmuls use bf16 inputs (f32 accum),
    # so tolerances are loosened accordingly.
    logits = jax.block_until_ready(lstm_stack_logits(x, params, L))
    h_ref = x
    for layer in range(L):
        h_ref = _reference_lstm_layer(h_ref, params[f"w_ih_t_{layer}"],
                                      params[f"w_hh_t_{layer}"], params[f"b_{layer}"])
    logits_ref = h_ref[-1] @ params["fc_w_t"] + params["fc_b"]
    assert jnp.allclose(logits, logits_ref, rtol=5e-2, atol=5e-2), \
        "fused LSTM+fc mismatch vs reference"

    out_ref = jax.nn.softmax(logits_ref, axis=-1)[:, 0]
    assert jnp.allclose(out, out_ref, rtol=5e-2, atol=5e-2), \
        "module output mismatch vs reference"

    print("KERNEL_OK")
</pallas_src>

<mosaic_0001>
module attributes {stable_mosaic.version = 11 : i64} {
  func.func @kernel(%arg0: memref<64x16xbf16, #tpu.memory_space<vmem>>, %arg1: memref<16x128xbf16, #tpu.memory_space<vmem>>, %arg2: memref<32x128xbf16, #tpu.memory_space<vmem>>, %arg3: memref<1x128xf32, #tpu.memory_space<vmem>>, %arg4: memref<64x128xbf16, #tpu.memory_space<vmem>>, %arg5: memref<1x128xf32, #tpu.memory_space<vmem>>, %arg6: memref<1x32xf32, #tpu.memory_space<vmem>>, %arg7: memref<1x1xf32, #tpu.memory_space<vmem>>, %arg8: memref<8x1xf32, #tpu.memory_space<vmem>>) attributes {dimension_semantics = [], scalar_prefetch = 0 : i64, scratch_operands = 0 : i64, tpu.core_type = #tpu.core_type<tc>} {
    %c0 = arith.constant 0 : index
    %c0_0 = arith.constant 0 : index
    %0 = vector.load %arg0[%c0, %c0_0] : memref<64x16xbf16, #tpu.memory_space<vmem>>, vector<64x16xbf16>
    %c0_1 = arith.constant 0 : index
    %c0_2 = arith.constant 0 : index
    %1 = vector.load %arg1[%c0_1, %c0_2] : memref<16x128xbf16, #tpu.memory_space<vmem>>, vector<16x128xbf16>
    %cst = arith.constant dense<0.000000e+00> : vector<64x128xf32>
    %2 = tpu.matmul %0, %1, %cst {dimension_numbers = #tpu.dot_dimension_numbers<[1], [0], [0], [1], [0, 0, 1, 1], [], []>} : vector<64x16xbf16>, vector<16x128xbf16>, vector<64x128xf32> -> vector<64x128xf32>
    %c0_3 = arith.constant 0 : index
    %c0_4 = arith.constant 0 : index
    %3 = vector.load %arg3[%c0_3, %c0_4] : memref<1x128xf32, #tpu.memory_space<vmem>>, vector<1x128xf32>
    %4 = vector.broadcast %3 : vector<1x128xf32> to vector<64x128xf32>
    %5 = arith.addf %2, %4 : vector<64x128xf32>
    %c0_5 = arith.constant 0 : index
    %c0_6 = arith.constant 0 : index
    %6 = vector.load %arg2[%c0_5, %c0_6] : memref<32x128xbf16, #tpu.memory_space<vmem>>, vector<32x128xbf16>
    %c0_7 = arith.constant 0 : index
    %c0_8 = arith.constant 0 : index
    %7 = vector.load %arg4[%c0_7, %c0_8] : memref<64x128xbf16, #tpu.memory_space<vmem>>, vector<64x128xbf16>
    %c0_9 = arith.constant 0 : index
    %c0_10 = arith.constant 0 : index
    %8 = vector.load %arg5[%c0_9, %c0_10] : memref<1x128xf32, #tpu.memory_space<vmem>>, vector<1x128xf32>
    %cst_11 = arith.constant 0.000000e+00 : f32
    %9 = vector.broadcast %cst_11 : f32 to vector<8x32xf32>
    %cst_12 = arith.constant 0.000000e+00 : f32
    %10 = vector.broadcast %cst_12 : f32 to vector<8x32xf32>
    %cst_13 = arith.constant 0.000000e+00 : f32
    %11 = vector.broadcast %cst_13 : f32 to vector<8x32xf32>
    %cst_14 = arith.constant 0.000000e+00 : f32
    %12 = vector.broadcast %cst_14 : f32 to vector<8x32xf32>
    %13 = vector.extract_strided_slice %5 {offsets = [0, 0], sizes = [8, 128], strides = [1, 1]} : vector<64x128xf32> to vector<8x128xf32>
    %14 = arith.truncf %9 : vector<8x32xf32> to vector<8x32xbf16>
    %cst_15 = arith.constant dense<0.000000e+00> : vector<8x128xf32>
    %15 = tpu.matmul %14, %6, %cst_15 {dimension_numbers = #tpu.dot_dimension_numbers<[1], [0], [0], [1], [0, 0, 1, 1], [], []>} : vector<8x32xbf16>, vector<32x128xbf16>, vector<8x128xf32> -> vector<8x128xf32>
    %16 = arith.addf %13, %15 : vector<8x128xf32>
    %17 = arith.negf %16 : vector<8x128xf32>
    %18 = math.exp %17 : vector<8x128xf32>
    %cst_16 = arith.constant 1.000000e+00 : f32
    %19 = vector.broadcast %cst_16 : f32 to vector<8x128xf32>
    %20 = arith.addf %19, %18 : vector<8x128xf32>
    %21 = arith.divf %19, %20 : vector<8x128xf32>
    %22 = math.tanh %16 : vector<8x128xf32>
    %23 = vector.extract_strided_slice %21 {offsets = [0, 0], sizes = [8, 32], strides = [1, 1]} : vector<8x128xf32> to vector<8x32xf32>
    %24 = vector.extract_strided_slice %21 {offsets = [0, 32], sizes = [8, 32], strides = [1, 1]} : vector<8x128xf32> to vector<8x32xf32>
    %25 = vector.extract_strided_slice %22 {offsets = [0, 64], sizes = [8, 32], strides = [1, 1]} : vector<8x128xf32> to vector<8x32xf32>
    %26 = vector.extract_strided_slice %21 {offsets = [0, 96], sizes = [8, 32], strides = [1, 1]} : vector<8x128xf32> to vector<8x32xf32>
    %27 = arith.mulf %24, %11 : vector<8x32xf32>
    %28 = arith.mulf %23, %25 : vector<8x32xf32>
    %29 = arith.addf %27, %28 : vector<8x32xf32>
    %30 = math.tanh %29 : vector<8x32xf32>
    %31 = arith.mulf %26, %30 : vector<8x32xf32>
    %32 = vector.extract_strided_slice %5 {offsets = [8, 0], sizes = [8, 128], strides = [1, 1]} : vector<64x128xf32> to vector<8x128xf32>
    %33 = arith.truncf %31 : vector<8x32xf32> to vector<8x32xbf16>
    %cst_17 = arith.constant dense<0.000000e+00> : vector<8x128xf32>
    %34 = tpu.matmul %33, %6, %cst_17 {dimension_numbers = #tpu.dot_dimension_numbers<[1], [0], [0], [1], [0, 0, 1, 1], [], []>} : vector<8x32xbf16>, vector<32x128xbf16>, vector<8x128xf32> -> vector<8x128xf32>
    %35 = arith.addf %32, %34 : vector<8x128xf32>
    %36 = arith.negf %35 : vector<8x128xf32>
    %37 = math.exp %36 : vector<8x128xf32>
    %cst_18 = arith.constant 1.000000e+00 : f32
    %38 = vector.broadcast %cst_18 : f32 to vector<8x128xf32>
    %39 = arith.addf %38, %37 : vector<8x128xf32>
    %40 = arith.divf %38, %39 : vector<8x128xf32>
    %41 = math.tanh %35 : vector<8x128xf32>
    %42 = vector.extract_strided_slice %40 {offsets = [0, 0], sizes = [8, 32], strides = [1, 1]} : vector<8x128xf32> to vector<8x32xf32>
    %43 = vector.extract_strided_slice %40 {offsets = [0, 32], sizes = [8, 32], strides = [1, 1]} : vector<8x128xf32> to vector<8x32xf32>
    %44 = vector.extract_strided_slice %41 {offsets = [0, 64], sizes = [8, 32], strides = [1, 1]} : vector<8x128xf32> to vector<8x32xf32>
    %45 = vector.extract_strided_slice %40 {offsets = [0, 96], sizes = [8, 32], strides = [1, 1]} : vector<8x128xf32> to vector<8x32xf32>
    %46 = arith.mulf %43, %29 : vector<8x32xf32>
    %47 = arith.mulf %42, %44 : vector<8x32xf32>
    %48 = arith.addf %46, %47 : vector<8x32xf32>
    %49 = math.tanh %48 : vector<8x32xf32>
    %50 = arith.mulf %45, %49 : vector<8x32xf32>
    %51 = tpu.concatenate %31, %10 in 1 : vector<8x32xf32>, vector<8x32xf32> -> vector<8x64xf32>
    %52 = arith.truncf %51 : vector<8x64xf32> to vector<8x64xbf16>
    %cst_19 = arith.constant dense<0.000000e+00> : vector<8x128xf32>
    %53 = tpu.matmul %52, %7, %cst_19 {dimension_numbers = #tpu.dot_dimension_numbers<[1], [0], [0], [1], [0, 0, 1, 1], [], []>} : vector<8x64xbf16>, vector<64x128xbf16>, vector<8x128xf32> -> vector<8x128xf32>
    %54 = vector.broadcast %8 : vector<1x128xf32> to vector<8x128xf32>
    %55 = arith.addf %53, %54 : vector<8x128xf32>
    %56 = arith.negf %55 : vector<8x128xf32>
    %57 = math.exp %56 : vector<8x128xf32>
    %cst_20 = arith.constant 1.000000e+00 : f32
    %58 = vector.broadcast %cst_20 : f32 to vector<8x128xf32>
    %59 = arith.addf %58, %57 : vector<8x128xf32>
    %60 = arith.divf %58, %59 : vector<8x128xf32>
    %61 = math.tanh %55 : vector<8x128xf32>
    %62 = vector.extract_strided_slice %60 {offsets = [0, 0], sizes = [8, 32], strides = [1, 1]} : vector<8x128xf32> to vector<8x32xf32>
    %63 = vector.extract_strided_slice %60 {offsets = [0, 32], sizes = [8, 32], strides = [1, 1]} : vector<8x128xf32> to vector<8x32xf32>
    %64 = vector.extract_strided_slice %61 {offsets = [0, 64], sizes = [8, 32], strides = [1, 1]} : vector<8x128xf32> to vector<8x32xf32>
    %65 = vector.extract_strided_slice %60 {offsets = [0, 96], sizes = [8, 32], strides = [1, 1]} : vector<8x128xf32> to vector<8x32xf32>
    %66 = arith.mulf %63, %12 : vector<8x32xf32>
    %67 = arith.mulf %62, %64 : vector<8x32xf32>
    %68 = arith.addf %66, %67 : vector<8x32xf32>
    %69 = math.tanh %68 : vector<8x32xf32>
    %70 = arith.mulf %65, %69 : vector<8x32xf32>
    %71 = vector.extract_strided_slice %5 {offsets = [16, 0], sizes = [8, 128], strides = [1, 1]} : vector<64x128xf32> to vector<8x128xf32>
    %72 = arith.truncf %50 : vector<8x32xf32> to vector<8x32xbf16>
    %cst_21 = arith.constant dense<0.000000e+00> : vector<8x128xf32>
    %73 = tpu.matmul %72, %6, %cst_21 {dimension_numbers = #tpu.dot_dimension_numbers<[1], [0], [0], [1], [0, 0, 1, 1], [], []>} : vector<8x32xbf16>, vector<32x128xbf16>, vector<8x128xf32> -> vector<8x128xf32>
    %74 = arith.addf %71, %73 : vector<8x128xf32>
    %75 = arith.negf %74 : vector<8x128xf32>
    %76 = math.exp %75 : vector<8x128xf32>
    %cst_22 = arith.constant 1.000000e+00 : f32
    %77 = vector.broadcast %cst_22 : f32 to vector<8x128xf32>
    %78 = arith.addf %77, %76 : vector<8x128xf32>
    %79 = arith.divf %77, %78 : vector<8x128xf32>
    %80 = math.tanh %74 : vector<8x128xf32>
    %81 = vector.extract_strided_slice %79 {offsets = [0, 0], sizes = [8, 32], strides = [1, 1]} : vector<8x128xf32> to vector<8x32xf32>
    %82 = vector.extract_strided_slice %79 {offsets = [0, 32], sizes = [8, 32], strides = [1, 1]} : vector<8x128xf32> to vector<8x32xf32>
    %83 = vector.extract_strided_slice %80 {offsets = [0, 64], sizes = [8, 32], strides = [1, 1]} : vector<8x128xf32> to vector<8x32xf32>
    %84 = vector.extract_strided_slice %79 {offsets = [0, 96], sizes = [8, 32], strides = [1, 1]} : vector<8x128xf32> to vector<8x32xf32>
    %85 = arith.mulf %82, %48 : vector<8x32xf32>
    %86 = arith.mulf %81, %83 : vector<8x32xf32>
    %87 = arith.addf %85, %86 : vector<8x32xf32>
    %88 = math.tanh %87 : vector<8x32xf32>
    %89 = arith.mulf %84, %88 : vector<8x32xf32>
    %90 = tpu.concatenate %50, %70 in 1 : vector<8x32xf32>, vector<8x32xf32> -> vector<8x64xf32>
    %91 = arith.truncf %90 : vector<8x64xf32> to vector<8x64xbf16>
    %cst_23 = arith.constant dense<0.000000e+00> : vector<8x128xf32>
    %92 = tpu.matmul %91, %7, %cst_23 {dimension_numbers = #tpu.dot_dimension_numbers<[1], [0], [0], [1], [0, 0, 1, 1], [], []>} : vector<8x64xbf16>, vector<64x128xbf16>, vector<8x128xf32> -> vector<8x128xf32>
    %93 = vector.broadcast %8 : vector<1x128xf32> to vector<8x128xf32>
    %94 = arith.addf %92, %93 : vector<8x128xf32>
    %95 = arith.negf %94 : vector<8x128xf32>
    %96 = math.exp %95 : vector<8x128xf32>
    %cst_24 = arith.constant 1.000000e+00 : f32
    %97 = vector.broadcast %cst_24 : f32 to vector<8x128xf32>
    %98 = arith.addf %97, %96 : vector<8x128xf32>
    %99 = arith.divf %97, %98 : vector<8x128xf32>
    %100 = math.tanh %94 : vector<8x128xf32>
    %101 = vector.extract_strided_slice %99 {offsets = [0, 0], sizes = [8, 32], strides = [1, 1]} : vector<8x128xf32> to vector<8x32xf32>
    %102 = vector.extract_strided_slice %99 {offsets = [0, 32], sizes = [8, 32], strides = [1, 1]} : vector<8x128xf32> to vector<8x32xf32>
    %103 = vector.extract_strided_slice %100 {offsets = [0, 64], sizes = [8, 32], strides = [1, 1]} : vector<8x128xf32> to vector<8x32xf32>
    %104 = vector.extract_strided_slice %99 {offsets = [0, 96], sizes = [8, 32], strides = [1, 1]} : vector<8x128xf32> to vector<8x32xf32>
    %105 = arith.mulf %102, %68 : vector<8x32xf32>
    %106 = arith.mulf %101, %103 : vector<8x32xf32>
    %107 = arith.addf %105, %106 : vector<8x32xf32>
    %108 = math.tanh %107 : vector<8x32xf32>
    %109 = arith.mulf %104, %108 : vector<8x32xf32>
    %110 = vector.extract_strided_slice %5 {offsets = [24, 0], sizes = [8, 128], strides = [1, 1]} : vector<64x128xf32> to vector<8x128xf32>
    %111 = arith.truncf %89 : vector<8x32xf32> to vector<8x32xbf16>
    %cst_25 = arith.constant dense<0.000000e+00> : vector<8x128xf32>
    %112 = tpu.matmul %111, %6, %cst_25 {dimension_numbers = #tpu.dot_dimension_numbers<[1], [0], [0], [1], [0, 0, 1, 1], [], []>} : vector<8x32xbf16>, vector<32x128xbf16>, vector<8x128xf32> -> vector<8x128xf32>
    %113 = arith.addf %110, %112 : vector<8x128xf32>
    %114 = arith.negf %113 : vector<8x128xf32>
    %115 = math.exp %114 : vector<8x128xf32>
    %cst_26 = arith.constant 1.000000e+00 : f32
    %116 = vector.broadcast %cst_26 : f32 to vector<8x128xf32>
    %117 = arith.addf %116, %115 : vector<8x128xf32>
    %118 = arith.divf %116, %117 : vector<8x128xf32>
    %119 = math.tanh %113 : vector<8x128xf32>
    %120 = vector.extract_strided_slice %118 {offsets = [0, 0], sizes = [8, 32], strides = [1, 1]} : vector<8x128xf32> to vector<8x32xf32>
    %121 = vector.extract_strided_slice %118 {offsets = [0, 32], sizes = [8, 32], strides = [1, 1]} : vector<8x128xf32> to vector<8x32xf32>
    %122 = vector.extract_strided_slice %119 {offsets = [0, 64], sizes = [8, 32], strides = [1, 1]} : vector<8x128xf32> to vector<8x32xf32>
    %123 = vector.extract_strided_slice %118 {offsets = [0, 96], sizes = [8, 32], strides = [1, 1]} : vector<8x128xf32> to vector<8x32xf32>
    %124 = arith.mulf %121, %87 : vector<8x32xf32>
    %125 = arith.mulf %120, %122 : vector<8x32xf32>
    %126 = arith.addf %124, %125 : vector<8x32xf32>
    %127 = math.tanh %126 : vector<8x32xf32>
    %128 = arith.mulf %123, %127 : vector<8x32xf32>
    %129 = tpu.concatenate %89, %109 in 1 : vector<8x32xf32>, vector<8x32xf32> -> vector<8x64xf32>
    %130 = arith.truncf %129 : vector<8x64xf32> to vector<8x64xbf16>
    %cst_27 = arith.constant dense<0.000000e+00> : vector<8x128xf32>
    %131 = tpu.matmul %130, %7, %cst_27 {dimension_numbers = #tpu.dot_dimension_numbers<[1], [0], [0], [1], [0, 0, 1, 1], [], []>} : vector<8x64xbf16>, vector<64x128xbf16>, vector<8x128xf32> -> vector<8x128xf32>
    %132 = vector.broadcast %8 : vector<1x128xf32> to vector<8x128xf32>
    %133 = arith.addf %131, %132 : vector<8x128xf32>
    %134 = arith.negf %133 : vector<8x128xf32>
    %135 = math.exp %134 : vector<8x128xf32>
    %cst_28 = arith.constant 1.000000e+00 : f32
    %136 = vector.broadcast %cst_28 : f32 to vector<8x128xf32>
    %137 = arith.addf %136, %135 : vector<8x128xf32>
    %138 = arith.divf %136, %137 : vector<8x128xf32>
    %139 = math.tanh %133 : vector<8x128xf32>
    %140 = vector.extract_strided_slice %138 {offsets = [0, 0], sizes = [8, 32], strides = [1, 1]} : vector<8x128xf32> to vector<8x32xf32>
    %141 = vector.extract_strided_slice %138 {offsets = [0, 32], sizes = [8, 32], strides = [1, 1]} : vector<8x128xf32> to vector<8x32xf32>
    %142 = vector.extract_strided_slice %139 {offsets = [0, 64], sizes = [8, 32], strides = [1, 1]} : vector<8x128xf32> to vector<8x32xf32>
    %143 = vector.extract_strided_slice %138 {offsets = [0, 96], sizes = [8, 32], strides = [1, 1]} : vector<8x128xf32> to vector<8x32xf32>
    %144 = arith.mulf %141, %107 : vector<8x32xf32>
    %145 = arith.mulf %140, %142 : vector<8x32xf32>
    %146 = arith.addf %144, %145 : vector<8x32xf32>
    %147 = math.tanh %146 : vector<8x32xf32>
    %148 = arith.mulf %143, %147 : vector<8x32xf32>
    %149 = vector.extract_strided_slice %5 {offsets = [32, 0], sizes = [8, 128], strides = [1, 1]} : vector<64x128xf32> to vector<8x128xf32>
    %150 = arith.truncf %128 : vector<8x32xf32> to vector<8x32xbf16>
    %cst_29 = arith.constant dense<0.000000e+00> : vector<8x128xf32>
    %151 = tpu.matmul %150, %6, %cst_29 {dimension_numbers = #tpu.dot_dimension_numbers<[1], [0], [0], [1], [0, 0, 1, 1], [], []>} : vector<8x32xbf16>, vector<32x128xbf16>, vector<8x128xf32> -> vector<8x128xf32>
    %152 = arith.addf %149, %151 : vector<8x128xf32>
    %153 = arith.negf %152 : vector<8x128xf32>
    %154 = math.exp %153 : vector<8x128xf32>
    %cst_30 = arith.constant 1.000000e+00 : f32
    %155 = vector.broadcast %cst_30 : f32 to vector<8x128xf32>
    %156 = arith.addf %155, %154 : vector<8x128xf32>
    %157 = arith.divf %155, %156 : vector<8x128xf32>
    %158 = math.tanh %152 : vector<8x128xf32>
    %159 = vector.extract_strided_slice %157 {offsets = [0, 0], sizes = [8, 32], strides = [1, 1]} : vector<8x128xf32> to vector<8x32xf32>
    %160 = vector.extract_strided_slice %157 {offsets = [0, 32], sizes = [8, 32], strides = [1, 1]} : vector<8x128xf32> to vector<8x32xf32>
    %161 = vector.extract_strided_slice %158 {offsets = [0, 64], sizes = [8, 32], strides = [1, 1]} : vector<8x128xf32> to vector<8x32xf32>
    %162 = vector.extract_strided_slice %157 {offsets = [0, 96], sizes = [8, 32], strides = [1, 1]} : vector<8x128xf32> to vector<8x32xf32>
    %163 = arith.mulf %160, %126 : vector<8x32xf32>
    %164 = arith.mulf %159, %161 : vector<8x32xf32>
    %165 = arith.addf %163, %164 : vector<8x32xf32>
    %166 = math.tanh %165 : vector<8x32xf32>
    %167 = arith.mulf %162, %166 : vector<8x32xf32>
    %168 = tpu.concatenate %128, %148 in 1 : vector<8x32xf32>, vector<8x32xf32> -> vector<8x64xf32>
    %169 = arith.truncf %168 : vector<8x64xf32> to vector<8x64xbf16>
    %cst_31 = arith.constant dense<0.000000e+00> : vector<8x128xf32>
    %170 = tpu.matmul %169, %7, %cst_31 {dimension_numbers = #tpu.dot_dimension_numbers<[1], [0], [0], [1], [0, 0, 1, 1], [], []>} : vector<8x64xbf16>, vector<64x128xbf16>, vector<8x128xf32> -> vector<8x128xf32>
    %171 = vector.broadcast %8 : vector<1x128xf32> to vector<8x128xf32>
    %172 = arith.addf %170, %171 : vector<8x128xf32>
    %173 = arith.negf %172 : vector<8x128xf32>
    %174 = math.exp %173 : vector<8x128xf32>
    %cst_32 = arith.constant 1.000000e+00 : f32
    %175 = vector.broadcast %cst_32 : f32 to vector<8x128xf32>
    %176 = arith.addf %175, %174 : vector<8x128xf32>
    %177 = arith.divf %175, %176 : vector<8x128xf32>
    %178 = math.tanh %172 : vector<8x128xf32>
    %179 = vector.extract_strided_slice %177 {offsets = [0, 0], sizes = [8, 32], strides = [1, 1]} : vector<8x128xf32> to vector<8x32xf32>
    %180 = vector.extract_strided_slice %177 {offsets = [0, 32], sizes = [8, 32], strides = [1, 1]} : vector<8x128xf32> to vector<8x32xf32>
    %181 = vector.extract_strided_slice %178 {offsets = [0, 64], sizes = [8, 32], strides = [1, 1]} : vector<8x128xf32> to vector<8x32xf32>
    %182 = vector.extract_strided_slice %177 {offsets = [0, 96], sizes = [8, 32], strides = [1, 1]} : vector<8x128xf32> to vector<8x32xf32>
    %183 = arith.mulf %180, %146 : vector<8x32xf32>
    %184 = arith.mulf %179, %181 : vector<8x32xf32>
    %185 = arith.addf %183, %184 : vector<8x32xf32>
    %186 = math.tanh %185 : vector<8x32xf32>
    %187 = arith.mulf %182, %186 : vector<8x32xf32>
    %188 = vector.extract_strided_slice %5 {offsets = [40, 0], sizes = [8, 128], strides = [1, 1]} : vector<64x128xf32> to vector<8x128xf32>
    %189 = arith.truncf %167 : vector<8x32xf32> to vector<8x32xbf16>
    %cst_33 = arith.constant dense<0.000000e+00> : vector<8x128xf32>
    %190 = tpu.matmul %189, %6, %cst_33 {dimension_numbers = #tpu.dot_dimension_numbers<[1], [0], [0], [1], [0, 0, 1, 1], [], []>} : vector<8x32xbf16>, vector<32x128xbf16>, vector<8x128xf32> -> vector<8x128xf32>
    %191 = arith.addf %188, %190 : vector<8x128xf32>
    %192 = arith.negf %191 : vector<8x128xf32>
    %193 = math.exp %192 : vector<8x128xf32>
    %cst_34 = arith.constant 1.000000e+00 : f32
    %194 = vector.broadcast %cst_34 : f32 to vector<8x128xf32>
    %195 = arith.addf %194, %193 : vector<8x128xf32>
    %196 = arith.divf %194, %195 : vector<8x128xf32>
    %197 = math.tanh %191 : vector<8x128xf32>
    %198 = vector.extract_strided_slice %196 {offsets = [0, 0], sizes = [8, 32], strides = [1, 1]} : vector<8x128xf32> to vector<8x32xf32>
    %199 = vector.extract_strided_slice %196 {offsets = [0, 32], sizes = [8, 32], strides = [1, 1]} : vector<8x128xf32> to vector<8x32xf32>
    %200 = vector.extract_strided_slice %197 {offsets = [0, 64], sizes = [8, 32], strides = [1, 1]} : vector<8x128xf32> to vector<8x32xf32>
    %201 = vector.extract_strided_slice %196 {offsets = [0, 96], sizes = [8, 32], strides = [1, 1]} : vector<8x128xf32> to vector<8x32xf32>
    %202 = arith.mulf %199, %165 : vector<8x32xf32>
    %203 = arith.mulf %198, %200 : vector<8x32xf32>
    %204 = arith.addf %202, %203 : vector<8x32xf32>
    %205 = math.tanh %204 : vector<8x32xf32>
    %206 = arith.mulf %201, %205 : vector<8x32xf32>
    %207 = tpu.concatenate %167, %187 in 1 : vector<8x32xf32>, vector<8x32xf32> -> vector<8x64xf32>
    %208 = arith.truncf %207 : vector<8x64xf32> to vector<8x64xbf16>
    %cst_35 = arith.constant dense<0.000000e+00> : vector<8x128xf32>
    %209 = tpu.matmul %208, %7, %cst_35 {dimension_numbers = #tpu.dot_dimension_numbers<[1], [0], [0], [1], [0, 0, 1, 1], [], []>} : vector<8x64xbf16>, vector<64x128xbf16>, vector<8x128xf32> -> vector<8x128xf32>
    %210 = vector.broadcast %8 : vector<1x128xf32> to vector<8x128xf32>
    %211 = arith.addf %209, %210 : vector<8x128xf32>
    %212 = arith.negf %211 : vector<8x128xf32>
    %213 = math.exp %212 : vector<8x128xf32>
    %cst_36 = arith.constant 1.000000e+00 : f32
    %214 = vector.broadcast %cst_36 : f32 to vector<8x128xf32>
    %215 = arith.addf %214, %213 : vector<8x128xf32>
    %216 = arith.divf %214, %215 : vector<8x128xf32>
    %217 = math.tanh %211 : vector<8x128xf32>
    %218 = vector.extract_strided_slice %216 {offsets = [0, 0], sizes = [8, 32], strides = [1, 1]} : vector<8x128xf32> to vector<8x32xf32>
    %219 = vector.extract_strided_slice %216 {offsets = [0, 32], sizes = [8, 32], strides = [1, 1]} : vector<8x128xf32> to vector<8x32xf32>
    %220 = vector.extract_strided_slice %217 {offsets = [0, 64], sizes = [8, 32], strides = [1, 1]} : vector<8x128xf32> to vector<8x32xf32>
    %221 = vector.extract_strided_slice %216 {offsets = [0, 96], sizes = [8, 32], strides = [1, 1]} : vector<8x128xf32> to vector<8x32xf32>
    %222 = arith.mulf %219, %185 : vector<8x32xf32>
    %223 = arith.mulf %218, %220 : vector<8x32xf32>
    %224 = arith.addf %222, %223 : vector<8x32xf32>
    %225 = math.tanh %224 : vector<8x32xf32>
    %226 = arith.mulf %221, %225 : vector<8x32xf32>
    %227 = vector.extract_strided_slice %5 {offsets = [48, 0], sizes = [8, 128], strides = [1, 1]} : vector<64x128xf32> to vector<8x128xf32>
    %228 = arith.truncf %206 : vector<8x32xf32> to vector<8x32xbf16>
    %cst_37 = arith.constant dense<0.000000e+00> : vector<8x128xf32>
    %229 = tpu.matmul %228, %6, %cst_37 {dimension_numbers = #tpu.dot_dimension_numbers<[1], [0], [0], [1], [0, 0, 1, 1], [], []>} : vector<8x32xbf16>, vector<32x128xbf16>, vector<8x128xf32> -> vector<8x128xf32>
    %230 = arith.addf %227, %229 : vector<8x128xf32>
    %231 = arith.negf %230 : vector<8x128xf32>
    %232 = math.exp %231 : vector<8x128xf32>
    %cst_38 = arith.constant 1.000000e+00 : f32
    %233 = vector.broadcast %cst_38 : f32 to vector<8x128xf32>
    %234 = arith.addf %233, %232 : vector<8x128xf32>
    %235 = arith.divf %233, %234 : vector<8x128xf32>
    %236 = math.tanh %230 : vector<8x128xf32>
    %237 = vector.extract_strided_slice %235 {offsets = [0, 0], sizes = [8, 32], strides = [1, 1]} : vector<8x128xf32> to vector<8x32xf32>
    %238 = vector.extract_strided_slice %235 {offsets = [0, 32], sizes = [8, 32], strides = [1, 1]} : vector<8x128xf32> to vector<8x32xf32>
    %239 = vector.extract_strided_slice %236 {offsets = [0, 64], sizes = [8, 32], strides = [1, 1]} : vector<8x128xf32> to vector<8x32xf32>
    %240 = vector.extract_strided_slice %235 {offsets = [0, 96], sizes = [8, 32], strides = [1, 1]} : vector<8x128xf32> to vector<8x32xf32>
    %241 = arith.mulf %238, %204 : vector<8x32xf32>
    %242 = arith.mulf %237, %239 : vector<8x32xf32>
    %243 = arith.addf %241, %242 : vector<8x32xf32>
    %244 = math.tanh %243 : vector<8x32xf32>
    %245 = arith.mulf %240, %244 : vector<8x32xf32>
    %246 = tpu.concatenate %206, %226 in 1 : vector<8x32xf32>, vector<8x32xf32> -> vector<8x64xf32>
    %247 = arith.truncf %246 : vector<8x64xf32> to vector<8x64xbf16>
    %cst_39 = arith.constant dense<0.000000e+00> : vector<8x128xf32>
    %248 = tpu.matmul %247, %7, %cst_39 {dimension_numbers = #tpu.dot_dimension_numbers<[1], [0], [0], [1], [0, 0, 1, 1], [], []>} : vector<8x64xbf16>, vector<64x128xbf16>, vector<8x128xf32> -> vector<8x128xf32>
    %249 = vector.broadcast %8 : vector<1x128xf32> to vector<8x128xf32>
    %250 = arith.addf %248, %249 : vector<8x128xf32>
    %251 = arith.negf %250 : vector<8x128xf32>
    %252 = math.exp %251 : vector<8x128xf32>
    %cst_40 = arith.constant 1.000000e+00 : f32
    %253 = vector.broadcast %cst_40 : f32 to vector<8x128xf32>
    %254 = arith.addf %253, %252 : vector<8x128xf32>
    %255 = arith.divf %253, %254 : vector<8x128xf32>
    %256 = math.tanh %250 : vector<8x128xf32>
    %257 = vector.extract_strided_slice %255 {offsets = [0, 0], sizes = [8, 32], strides = [1, 1]} : vector<8x128xf32> to vector<8x32xf32>
    %258 = vector.extract_strided_slice %255 {offsets = [0, 32], sizes = [8, 32], strides = [1, 1]} : vector<8x128xf32> to vector<8x32xf32>
    %259 = vector.extract_strided_slice %256 {offsets = [0, 64], sizes = [8, 32], strides = [1, 1]} : vector<8x128xf32> to vector<8x32xf32>
    %260 = vector.extract_strided_slice %255 {offsets = [0, 96], sizes = [8, 32], strides = [1, 1]} : vector<8x128xf32> to vector<8x32xf32>
    %261 = arith.mulf %258, %224 : vector<8x32xf32>
    %262 = arith.mulf %257, %259 : vector<8x32xf32>
    %263 = arith.addf %261, %262 : vector<8x32xf32>
    %264 = math.tanh %263 : vector<8x32xf32>
    %265 = arith.mulf %260, %264 : vector<8x32xf32>
    %266 = vector.extract_strided_slice %5 {offsets = [56, 0], sizes = [8, 128], strides = [1, 1]} : vector<64x128xf32> to vector<8x128xf32>
    %267 = arith.truncf %245 : vector<8x32xf32> to vector<8x32xbf16>
    %cst_41 = arith.constant dense<0.000000e+00> : vector<8x128xf32>
    %268 = tpu.matmul %267, %6, %cst_41 {dimension_numbers = #tpu.dot_dimension_numbers<[1], [0], [0], [1], [0, 0, 1, 1], [], []>} : vector<8x32xbf16>, vector<32x128xbf16>, vector<8x128xf32> -> vector<8x128xf32>
    %269 = arith.addf %266, %268 : vector<8x128xf32>
    %270 = arith.negf %269 : vector<8x128xf32>
    %271 = math.exp %270 : vector<8x128xf32>
    %cst_42 = arith.constant 1.000000e+00 : f32
    %272 = vector.broadcast %cst_42 : f32 to vector<8x128xf32>
    %273 = arith.addf %272, %271 : vector<8x128xf32>
    %274 = arith.divf %272, %273 : vector<8x128xf32>
    %275 = math.tanh %269 : vector<8x128xf32>
    %276 = vector.extract_strided_slice %274 {offsets = [0, 0], sizes = [8, 32], strides = [1, 1]} : vector<8x128xf32> to vector<8x32xf32>
    %277 = vector.extract_strided_slice %274 {offsets = [0, 32], sizes = [8, 32], strides = [1, 1]} : vector<8x128xf32> to vector<8x32xf32>
    %278 = vector.extract_strided_slice %275 {offsets = [0, 64], sizes = [8, 32], strides = [1, 1]} : vector<8x128xf32> to vector<8x32xf32>
    %279 = vector.extract_strided_slice %274 {offsets = [0, 96], sizes = [8, 32], strides = [1, 1]} : vector<8x128xf32> to vector<8x32xf32>
    %280 = arith.mulf %277, %243 : vector<8x32xf32>
    %281 = arith.mulf %276, %278 : vector<8x32xf32>
    %282 = arith.addf %280, %281 : vector<8x32xf32>
    %283 = math.tanh %282 : vector<8x32xf32>
    %284 = arith.mulf %279, %283 : vector<8x32xf32>
    %285 = tpu.concatenate %245, %265 in 1 : vector<8x32xf32>, vector<8x32xf32> -> vector<8x64xf32>
    %286 = arith.truncf %285 : vector<8x64xf32> to vector<8x64xbf16>
    %cst_43 = arith.constant dense<0.000000e+00> : vector<8x128xf32>
    %287 = tpu.matmul %286, %7, %cst_43 {dimension_numbers = #tpu.dot_dimension_numbers<[1], [0], [0], [1], [0, 0, 1, 1], [], []>} : vector<8x64xbf16>, vector<64x128xbf16>, vector<8x128xf32> -> vector<8x128xf32>
    %288 = vector.broadcast %8 : vector<1x128xf32> to vector<8x128xf32>
    %289 = arith.addf %287, %288 : vector<8x128xf32>
    %290 = arith.negf %289 : vector<8x128xf32>
    %291 = math.exp %290 : vector<8x128xf32>
    %cst_44 = arith.constant 1.000000e+00 : f32
    %292 = vector.broadcast %cst_44 : f32 to vector<8x128xf32>
    %293 = arith.addf %292, %291 : vector<8x128xf32>
    %294 = arith.divf %292, %293 : vector<8x128xf32>
    %295 = math.tanh %289 : vector<8x128xf32>
    %296 = vector.extract_strided_slice %294 {offsets = [0, 0], sizes = [8, 32], strides = [1, 1]} : vector<8x128xf32> to vector<8x32xf32>
    %297 = vector.extract_strided_slice %294 {offsets = [0, 32], sizes = [8, 32], strides = [1, 1]} : vector<8x128xf32> to vector<8x32xf32>
    %298 = vector.extract_strided_slice %295 {offsets = [0, 64], sizes = [8, 32], strides = [1, 1]} : vector<8x128xf32> to vector<8x32xf32>
    %299 = vector.extract_strided_slice %294 {offsets = [0, 96], sizes = [8, 32], strides = [1, 1]} : vector<8x128xf32> to vector<8x32xf32>
    %300 = arith.mulf %297, %263 : vector<8x32xf32>
    %301 = arith.mulf %296, %298 : vector<8x32xf32>
    %302 = arith.addf %300, %301 : vector<8x32xf32>
    %303 = math.tanh %302 : vector<8x32xf32>
    %304 = arith.mulf %299, %303 : vector<8x32xf32>
    %305 = tpu.concatenate %284, %304 in 1 : vector<8x32xf32>, vector<8x32xf32> -> vector<8x64xf32>
    %306 = arith.truncf %305 : vector<8x64xf32> to vector<8x64xbf16>
    %cst_45 = arith.constant dense<0.000000e+00> : vector<8x128xf32>
    %307 = tpu.matmul %306, %7, %cst_45 {dimension_numbers = #tpu.dot_dimension_numbers<[1], [0], [0], [1], [0, 0, 1, 1], [], []>} : vector<8x64xbf16>, vector<64x128xbf16>, vector<8x128xf32> -> vector<8x128xf32>
    %308 = vector.broadcast %8 : vector<1x128xf32> to vector<8x128xf32>
    %309 = arith.addf %307, %308 : vector<8x128xf32>
    %310 = arith.negf %309 : vector<8x128xf32>
    %311 = math.exp %310 : vector<8x128xf32>
    %cst_46 = arith.constant 1.000000e+00 : f32
    %312 = vector.broadcast %cst_46 : f32 to vector<8x128xf32>
    %313 = arith.addf %312, %311 : vector<8x128xf32>
    %314 = arith.divf %312, %313 : vector<8x128xf32>
    %315 = math.tanh %309 : vector<8x128xf32>
    %316 = vector.extract_strided_slice %314 {offsets = [0, 0], sizes = [8, 32], strides = [1, 1]} : vector<8x128xf32> to vector<8x32xf32>
    %317 = vector.extract_strided_slice %314 {offsets = [0, 32], sizes = [8, 32], strides = [1, 1]} : vector<8x128xf32> to vector<8x32xf32>
    %318 = vector.extract_strided_slice %315 {offsets = [0, 64], sizes = [8, 32], strides = [1, 1]} : vector<8x128xf32> to vector<8x32xf32>
    %319 = vector.extract_strided_slice %314 {offsets = [0, 96], sizes = [8, 32], strides = [1, 1]} : vector<8x128xf32> to vector<8x32xf32>
    %320 = arith.mulf %317, %302 : vector<8x32xf32>
    %321 = arith.mulf %316, %318 : vector<8x32xf32>
    %322 = arith.addf %320, %321 : vector<8x32xf32>
    %323 = math.tanh %322 : vector<8x32xf32>
    %324 = arith.mulf %319, %323 : vector<8x32xf32>
    %c0_47 = arith.constant 0 : index
    %c0_48 = arith.constant 0 : index
    %325 = vector.load %arg6[%c0_47, %c0_48] : memref<1x32xf32, #tpu.memory_space<vmem>>, vector<1x32xf32>
    %326 = vector.broadcast %325 : vector<1x32xf32> to vector<8x32xf32>
    %327 = arith.mulf %324, %326 : vector<8x32xf32>
    %cst_49 = arith.constant dense<0.000000e+00> : vector<8xf32>
    %328 = vector.multi_reduction <add>, %327, %cst_49 [1] : vector<8x32xf32> to vector<8xf32>
    %329 = vector.shape_cast %328 : vector<8xf32> to vector<8x1xf32>
    %c0_50 = arith.constant 0 : index
    %c0_51 = arith.constant 0 : index
    %330 = vector.load %arg7[%c0_50, %c0_51] : memref<1x1xf32, #tpu.memory_space<vmem>>, vector<1x1xf32>
    %331 = vector.broadcast %330 : vector<1x1xf32> to vector<8x1xf32>
    %332 = arith.addf %329, %331 : vector<8x1xf32>
    %c0_52 = arith.constant 0 : index
    %c0_53 = arith.constant 0 : index
    %333 = vector.load %arg8[%c0_52, %c0_53] : memref<8x1xf32, #tpu.memory_space<vmem>>, vector<8x1xf32>
    tpu.vector_store %arg8[%c0_52, %c0_53], %332 {strides = array<i32>} : memref<8x1xf32, #tpu.memory_space<vmem>>, vector<8x1xf32>,
    return
  }
}

</mosaic_0001>

<bundles_post_ra>
// kernel: lstm_module_forward.1
= control target key start
LH: loop header
LB: loop body
LE: loop exit
PB: predicated region body
PF: predicated region fallthrough
CT: control target
= control target key end

     0   :  { %vm72_vm0 = vcmask 130048   ;;  %v1381_v4 = vmov 0   ;;  %s1383_s14 = smov 32   ;;  %vm139_vm5 = vcmask 261120   ;;  %vm285_vm6 = vcmask 523264   ;;  %s1384_s11 = smov 96   ;;  %s1722_s1 = inlined_call_operand.vmem [shape: bf16[16,128], index: 1, kind: input, shape index: {}]   ;;  %s1723_s2 = inlined_call_operand.vmem [shape: bf16[32,128], index: 2, kind: input, shape index: {}]   ;;  %s1724_s0 = inlined_call_operand.vmem [shape: bf16[64,16], index: 0, kind: input, shape index: {}]   ;;  %s1725_s3 = inlined_call_operand.vmem [shape: f32[1,128], index: 3, kind: input, shape index: {}]   ;;  %s1726_s4 = inlined_call_operand.vmem [shape: bf16[64,128], index: 4, kind: input, shape index: {}]   ;;  %s1727_s5 = inlined_call_operand.vmem [shape: f32[1,128], index: 5, kind: input, shape index: {}]   ;;  %s1728_s6 = inlined_call_operand.vmem [shape: f32[1,32], index: 6, kind: input, shape index: {}]   ;;  %s1729_s7 = inlined_call_operand.<no memory space> [shape: f32[1,1], index: 7, kind: input, shape index: {}]   ;;  %s1730_s8 = inlined_call_operand.vmem [shape: f32[8,1], index: 8, kind: output, shape index: {}]  }
   0x1   :  { %v1236_v0 = vld [vmem:[%s1722_s1] sm:$0xff]  ;;  %v1436_v1 = vld [vmem:[%s1723_s2 + $0x8] sm:$0xff]  ;;  %v1470_v34 = vld [vmem:[%s1726_s4 + $0x18] sm:$0xff] }
   0x2   :  { %v1232_v2 = vld [vmem:[%s1724_s0] sm:$0xff]  ;;  %92 = vmatpush.bf16.msra.mxu0 %v1236_v0  ;;  %149 = vmatpush.bf16.msra.mxu1 %v1436_v1  ;;  %v1476_v35 = vld [vmem:[%s1726_s4 + $0x10] sm:$0xff]  ;;  %v1485_v36 = vld [vmem:[%s1726_s4 + $0x8] sm:$0xff] }
   0x3   :  { %v1445_v3 = vld [vmem:[%s1723_s2] sm:$0xff]  ;;  %207 = vmatpush.bf16.msra.mxu2 %v1436_v1  ;;  %s1382_s2 = smov 64   ;;  %293 = vmatpush.bf16.msra.mxu3 %v1470_v34 }
   0x4   :  { %v1456_v5 = vld [vmem:[%s1725_s3] ss:$0 sm:$0xff] }
   0x5   :  { %1173 = vmatmul.msk.bf16.vlgmr.msra.gmra.mxu0 %vm72_vm0, %v1232_v2  ;;  %v1497_v37 = vld [vmem:[%s1726_s4] sm:$0xff] }
   0x6   :  { %150 = vmatpush.bf16.msra.mxu1 %v1445_v3  ;;  %898 = vmatpush.bf16.msrb.mxu0 %v1470_v34  ;;  %v1519_v48 = vld [vmem:[%s1727_s5] ss:$0 sm:$0xff] }
   0x7   :  { %208 = vmatpush.bf16.msra.mxu2 %v1445_v3  ;;  %294 = vmatpush.bf16.msra.mxu3 %v1476_v35 }
   0x9   :  { %151 = vmatmul.bf16.vlgmr.msra.gmra.mxu1 %v1381_v4 }
   0xa   :  { %352 = vmatpush.bf16.msrb.mxu1 %v1436_v1  ;;  %899 = vmatpush.bf16.msrb.mxu0 %v1476_v35 }
   0xb   :  { %414 = vmatpush.bf16.msrb.mxu2 %v1470_v34  ;;  %295 = vmatpush.bf16.msra.mxu3 %v1485_v36 }
   0xe   :  { %353 = vmatpush.bf16.msrb.mxu1 %v1445_v3  ;;  %900 = vmatpush.bf16.msrb.mxu0 %v1485_v36 }
   0xf   :  { %415 = vmatpush.bf16.msrb.mxu2 %v1476_v35  ;;  %296 = vmatpush.bf16.msra.mxu3 %v1497_v37 }
  0x12   :  { %535 = vmatpush.bf16.msra.mxu1 %v1470_v34  ;;  %901 = vmatpush.bf16.msrb.mxu0 %v1497_v37 }
  0x13   :  { %416 = vmatpush.bf16.msrb.mxu2 %v1485_v36  ;;  %473 = vmatpush.bf16.msrb.mxu3 %v1436_v1 }
  0x16   :  { %536 = vmatpush.bf16.msra.mxu1 %v1476_v35 }
  0x17   :  { %417 = vmatpush.bf16.msrb.mxu2 %v1497_v37  ;;  %474 = vmatpush.bf16.msrb.mxu3 %v1445_v3 }
  0x1a   :  { %537 = vmatpush.bf16.msra.mxu1 %v1485_v36 }
  0x1e   :  { %538 = vmatpush.bf16.msra.mxu1 %v1497_v37 }
  0x82   :  { %v94_v6 = vpop.f32.mrf.mxu0 }
  0x83   :  { %v95_v7 = vadd.f32 %v1456_v5, %v94_v6 }
  0x86   :  { %v152_v8 = vpop.f32.mrf.mxu1 }
  0x87   :  { %v156_v9 = vadd.f32 %v152_v8, %v95_v7 }
  0x89   :  { %1251 = vtanh.f32 %v156_v9  ;;  %v1185_v12 = vmul.f32 -1.442695, %v156_v9 }
  0x8a   :  { %v96_v42 = vpop.f32.mrf.mxu0 }
  0x8b   :  { %1253 = vpow2.f32 %v1185_v12  ;;  %v97_v43 = vadd.f32 %v1456_v5, %v96_v42 }
  0x8e   :  { %v154_v10 = vpop.f32.mrf.mxu1 }
  0x8f   :  { %v1252_v11 = vpop.eup %1251 }
  0x90   :  { %179 = vrot.lane.b32.xlu0 %v1252_v11, %s1382_s2 }
  0x91   :  { %v1254_v13 = vpop.eup %1253 }
  0x92   :  { %v160_v14 = vadd.f32 1.0, %v1254_v13 }
  0x94   :  { %1255 = vrcp.f32 %v160_v14  ;;  %v172_v20 = vand.u32 2147483648, %v160_v14  ;;  %vm166_vm2 = vweird.f32 %v160_v14  ;;  %v170_v21 = vand.u32 2147483647, %v160_v14 }
  0x96   :  { %v173_v23 = vor.u32 1.1754944e-38, %v172_v20  ;;  %vm171_vm4 = vcmp.eq.f32.partialorder %v170_v21, 8.507059e+37 }
  0x9a   :  { %v1256_v15 = vpop.eup %1255 }
  0x9b   :  { %v162_v16 = vmul.f32 %v1256_v15, %v160_v14  ;;  %vm167_vm1 = vweird.f32 %v1256_v15 }
  0x9c   :  { %vm168_vm3 = vmor %vm166_vm2, %vm167_vm1 }
  0x9d   :  { %v163_v17 = vsub.f32 1.0, %v162_v16 }
  0x9f   :  { %v164_v18 = vmul.f32 %v1256_v15, %v163_v17 }
  0xa1   :  { %v165_v19 = vadd.f32 %v1256_v15, %v164_v18 }
  0xa3   :  { %v169_v22 = vsel %vm168_vm3, %v1256_v15, %v165_v19 }
  0xa4   :  { %v174_v25 = vsel %vm171_vm4, %v173_v23, %v169_v22 }
  0xa5   :  { %v177_v27 = vmul.f32 0.0, %v174_v25 }
 0x102   :  { %v180_v24 = vpop.permute.xlu0 %179 }
 0x103   :  { %v182_v26 = vmul.f32 %v180_v24, %v174_v25 }
 0x105   :  { %184 = vrot.lane.b32.xlu0 %v182_v26, %s1383_s14 }
 0x177   :  { %v185_v28 = vpop.permute.xlu0 %184 }
 0x178   :  { %v1461_v29 = vadd.f32 %v185_v28, %v177_v27 }
 0x17a   :  { %1257 = vtanh.f32 %v1461_v29 }
 0x180   :  { %v1258_v30 = vpop.eup %1257 }
 0x181   :  { %190 = vrot.lane.b32.xlu1 %v1258_v30, %s1382_s2 }
 0x1f3   :  { %v191_v31 = vpop.permute.xlu1 %190 }
 0x1f4   :  { %v193_v32 = vmul.f32 %v191_v31, %v174_v25 }
 0x1f6   :  { %253 = vrot.lane.b32.xlu1 %v193_v32, %s1383_s14  ;;  %v194_v33 = vpack.c.bf16 %v193_v32, %v193_v32 }
 0x1f8   :  { %196 = vrot.lane.b32.xlu2 %v194_v33, %s1383_s14 }
 0x252   :  { %v197_v38 = vpop.permute.xlu2 %196 }
 0x253   :  { %1186 = vmatmul.msk.bf16.vlgmr.msra.gmra.mxu2 %vm139_vm5, %v197_v38 }
 0x254   :  { %594 = vmatpush.bf16.msra.mxu2 %v1436_v1 }
 0x258   :  { %595 = vmatpush.bf16.msra.mxu2 %v1445_v3 }
 0x268   :  { %v254_v39 = vpop.permute.xlu1 %253 }
 0x269   :  { %v256_v40 = vsel %vm139_vm5, %v254_v39, 0.0  ;;  %v1233_v39 = vld [vmem:[%s1724_s0 + $0x8] sm:$0xff] }
 0x26a   :  { %v257_v41 = vpack.c.bf16 %v256_v40, %v256_v40  ;;  %1174 = vmatmul.msk.bf16.gmra.mxu0 %vm72_vm0, %v1233_v39 }
 0x26c   :  { %1204 = vmatmul.msk.bf16.vlgmr.msra.gmra.mxu3 %vm285_vm6, %v257_v41 }
 0x26d   :  { %656 = vmatpush.bf16.msra.mxu3 %v1470_v34 }
 0x271   :  { %657 = vmatpush.bf16.msra.mxu3 %v1476_v35 }
 0x275   :  { %658 = vmatpush.bf16.msra.mxu3 %v1485_v36 }
 0x279   :  { %659 = vmatpush.bf16.msra.mxu3 %v1497_v37 }
 0x2d6   :  { %v210_v44 = vpop.f32.mrf.mxu2 }
 0x2d7   :  { %v214_v45 = vadd.f32 %v210_v44, %v97_v43 }
 0x2d9   :  { %1259 = vtanh.f32 %v214_v45  ;;  %v1187_v53 = vmul.f32 -1.442695, %v214_v45 }
 0x2de   :  { %v212_v46 = vpop.f32.mrf.mxu2 }
 0x2df   :  { %v1260_v47 = vpop.eup %1259 }
 0x2e0   :  { %237 = vrot.lane.b32.xlu2 %v1260_v47, %s1382_s2 }
 0x2e7   :  { %v99_v45 = vpop.f32.mrf.mxu0 }
 0x2e8   :  { %v100_v46 = vadd.f32 %v1456_v5, %v99_v45 }
 0x2ef   :  { %v298_v49 = vpop.f32.mrf.mxu3 }
 0x2f0   :  { %v299_v50 = vadd.f32 %v1519_v48, %v298_v49 }
 0x2f2   :  { %1261 = vtanh.f32 %v299_v50  ;;  %v1205_v7 = vmul.f32 -1.442695, %v299_v50 }
 0x2f3   :  { %1263 = vpow2.f32 %v1187_v53 }
 0x2f7   :  { %v300_v51 = vpop.f32.mrf.mxu3 }
 0x2f8   :  { %v1262_v52 = vpop.eup %1261 }
 0x2f9   :  { %324 = vrot.lane.b32.xlu0 %v1262_v52, %s1382_s2  ;;  %v1264_v54 = vpop.eup %1263 }
 0x2fa   :  { %v218_v55 = vadd.f32 1.0, %v1264_v54 }
 0x2fc   :  { %1265 = vrcp.f32 %v218_v55  ;;  %v230_v61 = vand.u32 2147483648, %v218_v55  ;;  %vm224_vm8 = vweird.f32 %v218_v55  ;;  %v228_v62 = vand.u32 2147483647, %v218_v55 }
 0x2fd   :  { %1267 = vpow2.f32 %v1205_v7 }
 0x2fe   :  { %v231_v0 = vor.u32 1.1754944e-38, %v230_v61  ;;  %vm229_vm10 = vcmp.eq.f32.partialorder %v228_v62, 8.507059e+37 }
 0x302   :  { %v1266_v56 = vpop.eup %1265 }
 0x303   :  { %v220_v57 = vmul.f32 %v1266_v56, %v218_v55  ;;  %vm225_vm7 = vweird.f32 %v1266_v56  ;;  %v1268_v8 = vpop.eup %1267 }
 0x304   :  { %vm226_vm9 = vmor %vm224_vm8, %vm225_vm7  ;;  %v305_v9 = vadd.f32 1.0, %v1268_v8 }
 0x305   :  { %v221_v58 = vsub.f32 1.0, %v220_v57 }
 0x306   :  { %1269 = vrcp.f32 %v305_v9  ;;  %v317_v15 = vand.u32 2147483648, %v305_v9  ;;  %vm311_vm12 = vweird.f32 %v305_v9  ;;  %v315_v16 = vand.u32 2147483647, %v305_v9 }
 0x307   :  { %v222_v59 = vmul.f32 %v1266_v56, %v221_v58 }
 0x308   :  { %v318_v18 = vor.u32 1.1754944e-38, %v317_v15  ;;  %vm316_vm14 = vcmp.eq.f32.partialorder %v315_v16, 8.507059e+37 }
 0x309   :  { %v223_v60 = vadd.f32 %v1266_v56, %v222_v59 }
 0x30b   :  { %v227_v63 = vsel %vm226_vm9, %v1266_v56, %v223_v60 }
 0x30c   :  { %v232_v4 = vsel %vm229_vm10, %v231_v0, %v227_v63  ;;  %v1270_v10 = vpop.eup %1269 }
 0x30d   :  { %v307_v11 = vmul.f32 %v1270_v10, %v305_v9  ;;  %vm312_vm11 = vweird.f32 %v1270_v10  ;;  %v235_v22 = vmul.f32 %v232_v4, %v1461_v29 }
 0x30e   :  { %vm313_vm13 = vmor %vm311_vm12, %vm312_vm11 }
 0x30f   :  { %v308_v12 = vsub.f32 1.0, %v307_v11 }
 0x311   :  { %v309_v13 = vmul.f32 %v1270_v10, %v308_v12 }
 0x313   :  { %v310_v14 = vadd.f32 %v1270_v10, %v309_v13 }
 0x315   :  { %v314_v17 = vsel %vm313_vm13, %v1270_v10, %v310_v14 }
 0x316   :  { %v319_v20 = vsel %vm316_vm14, %v318_v18, %v314_v17 }
 0x317   :  { %v322_v26 = vmul.f32 0.0, %v319_v20 }
 0x33a   :  { %v238_v2 = vpop.permute.xlu2 %237 }
 0x33b   :  { %v240_v6 = vmul.f32 %v238_v2, %v232_v4 }
 0x33d   :  { %242 = vrot.lane.b32.xlu1 %v240_v6, %s1383_s14 }
 0x36b   :  { %v325_v19 = vpop.permute.xlu0 %324 }
 0x36c   :  { %v327_v21 = vmul.f32 %v325_v19, %v319_v20 }
 0x36e   :  { %329 = vrot.lane.b32.xlu2 %v327_v21, %s1383_s14 }
 0x3af   :  { %v243_v23 = vpop.permute.xlu1 %242 }
 0x3b0   :  { %v1526_v24 = vadd.f32 %v243_v23, %v235_v22 }
 0x3b2   :  { %1271 = vtanh.f32 %v1526_v24 }
 0x3b8   :  { %v1272_v25 = vpop.eup %1271 }
 0x3b9   :  { %248 = vrot.lane.b32.xlu0 %v1272_v25, %s1382_s2 }
 0x3c8   :  { %v330_v27 = vpop.permute.xlu2 %329 }
 0x3c9   :  { %v1530_v28 = vadd.f32 %v330_v27, %v322_v26 }
 0x3cb   :  { %1273 = vtanh.f32 %v1530_v28 }
 0x3d1   :  { %v1274_v30 = vpop.eup %1273 }
 0x3d2   :  { %335 = vrot.lane.b32.xlu1 %v1274_v30, %s1382_s2 }
 0x42b   :  { %v249_v31 = vpop.permute.xlu0 %248 }
 0x42c   :  { %v251_v32 = vmul.f32 %v249_v31, %v232_v4 }
 0x42e   :  { %v339_v29 = vpack.c.bf16 %v251_v32, %v251_v32  ;;  %398 = vrot.lane.b32.xlu2 %v251_v32, %s1383_s14 }
 0x430   :  { %341 = vrot.lane.b32.xlu1 %v339_v29, %s1383_s14 }
 0x444   :  { %v336_v33 = vpop.permute.xlu1 %335 }
 0x445   :  { %v338_v38 = vmul.f32 %v336_v33, %v319_v20 }
 0x447   :  { %402 = vrot.lane.b32.xlu0 %v338_v38, %s1382_s2 }
 0x488   :  { %v399_v41 = vpop.permute.xlu2 %398 }
 0x4a2   :  { %v342_v40 = vpop.permute.xlu1 %341 }
 0x4a3   :  { %1206 = vmatmul.msk.bf16.vlgmr.msrb.gmra.mxu1 %vm139_vm5, %v342_v40 }
 0x4a4   :  { %715 = vmatpush.bf16.msrb.mxu1 %v1436_v1 }
 0x4a8   :  { %716 = vmatpush.bf16.msrb.mxu1 %v1445_v3 }
 0x4b9   :  { %v403_v42 = vpop.permute.xlu0 %402 }
 0x4ba   :  { %v405_v43 = vsel %vm139_vm5, %v399_v41, %v403_v42 }
 0x4bb   :  { %v406_v44 = vpack.c.bf16 %v405_v43, %v405_v43 }
 0x4bd   :  { %1208 = vmatmul.msk.bf16.vlgmr.msrb.gmra.mxu2 %vm285_vm6, %v406_v44 }
 0x4be   :  { %777 = vmatpush.bf16.msrb.mxu2 %v1470_v34 }
 0x4c2   :  { %778 = vmatpush.bf16.msrb.mxu2 %v1476_v35 }
 0x4c6   :  { %779 = vmatpush.bf16.msrb.mxu2 %v1485_v36 }
 0x4ca   :  { %780 = vmatpush.bf16.msrb.mxu2 %v1497_v37 }
 0x520   :  { %v355_v47 = vpop.f32.mrf.mxu1 }
 0x521   :  { %v359_v49 = vadd.f32 %v355_v47, %v100_v46  ;;  %v101_v47 = vpop.f32.mrf.mxu0 }
 0x523   :  { %1275 = vtanh.f32 %v359_v49  ;;  %v1207_v56 = vmul.f32 -1.442695, %v359_v49  ;;  %v102_v49 = vadd.f32 %v1456_v5, %v101_v47 }
 0x528   :  { %v357_v50 = vpop.f32.mrf.mxu1 }
 0x529   :  { %v1276_v51 = vpop.eup %1275 }
 0x52a   :  { %382 = vrot.lane.b32.xlu2 %v1276_v51, %s1382_s2 }
 0x540   :  { %v419_v52 = vpop.f32.mrf.mxu2 }
 0x541   :  { %v420_v53 = vadd.f32 %v1519_v48, %v419_v52 }
 0x543   :  { %1277 = vtanh.f32 %v420_v53  ;;  %v1209_v10 = vmul.f32 -1.442695, %v420_v53 }
 0x544   :  { %1279 = vpow2.f32 %v1207_v56 }
 0x548   :  { %v421_v54 = vpop.f32.mrf.mxu2 }
 0x549   :  { %v1278_v55 = vpop.eup %1277 }
 0x54a   :  { %445 = vrot.lane.b32.xlu0 %v1278_v55, %s1382_s2  ;;  %v1280_v57 = vpop.eup %1279 }
 0x54b   :  { %v363_v58 = vadd.f32 1.0, %v1280_v57 }
 0x54d   :  { %1281 = vrcp.f32 %v363_v58  ;;  %v375_v0 = vand.u32 2147483648, %v363_v58  ;;  %vm369_vm1 = vweird.f32 %v363_v58  ;;  %v373_v2 = vand.u32 2147483647, %v363_v58 }
 0x54e   :  { %1283 = vpow2.f32 %v1209_v10 }
 0x54f   :  { %v376_v6 = vor.u32 1.1754944e-38, %v375_v0  ;;  %vm374_vm3 = vcmp.eq.f32.partialorder %v373_v2, 8.507059e+37 }
 0x553   :  { %v1282_v59 = vpop.eup %1281 }
 0x554   :  { %v365_v60 = vmul.f32 %v1282_v59, %v363_v58  ;;  %vm370_vm15 = vweird.f32 %v1282_v59  ;;  %v1284_v11 = vpop.eup %1283 }
 0x555   :  { %vm371_vm2 = vmor %vm369_vm1, %vm370_vm15  ;;  %v426_v12 = vadd.f32 1.0, %v1284_v11 }
 0x556   :  { %v366_v61 = vsub.f32 1.0, %v365_v60 }
 0x557   :  { %1285 = vrcp.f32 %v426_v12  ;;  %v438_v18 = vand.u32 2147483648, %v426_v12  ;;  %vm432_vm7 = vweird.f32 %v426_v12  ;;  %v436_v19 = vand.u32 2147483647, %v426_v12 }
 0x558   :  { %v367_v62 = vmul.f32 %v1282_v59, %v366_v61 }
 0x559   :  { %v439_v21 = vor.u32 1.1754944e-38, %v438_v18  ;;  %vm437_vm9 = vcmp.eq.f32.partialorder %v436_v19, 8.507059e+37 }
 0x55a   :  { %v368_v63 = vadd.f32 %v1282_v59, %v367_v62 }
 0x55c   :  { %v372_v4 = vsel %vm371_vm2, %v1282_v59, %v368_v63 }
 0x55d   :  { %v377_v8 = vsel %vm374_vm3, %v376_v6, %v372_v4  ;;  %v1286_v13 = vpop.eup %1285 }
 0x55e   :  { %v428_v14 = vmul.f32 %v1286_v13, %v426_v12  ;;  %vm433_vm4 = vweird.f32 %v1286_v13  ;;  %v380_v26 = vmul.f32 %v377_v8, %v1526_v24 }
 0x55f   :  { %vm434_vm8 = vmor %vm432_vm7, %vm433_vm4 }
 0x560   :  { %v429_v15 = vsub.f32 1.0, %v428_v14 }
 0x562   :  { %v430_v16 = vmul.f32 %v1286_v13, %v429_v15 }
 0x564   :  { %v431_v17 = vadd.f32 %v1286_v13, %v430_v16 }
 0x566   :  { %v435_v20 = vsel %vm434_vm8, %v1286_v13, %v431_v17 }
 0x567   :  { %v440_v23 = vsel %vm437_vm9, %v439_v21, %v435_v20 }
 0x568   :  { %v443_v32 = vmul.f32 %v440_v23, %v1530_v28 }
 0x584   :  { %v383_v7 = vpop.permute.xlu2 %382 }
 0x585   :  { %v385_v9 = vmul.f32 %v383_v7, %v377_v8 }
 0x587   :  { %387 = vrot.lane.b32.xlu1 %v385_v9, %s1383_s14 }
 0x5bc   :  { %v446_v22 = vpop.permute.xlu0 %445 }
 0x5bd   :  { %v448_v25 = vmul.f32 %v446_v22, %v440_v23 }
 0x5bf   :  { %450 = vrot.lane.b32.xlu2 %v448_v25, %s1383_s14 }
 0x5f9   :  { %v388_v27 = vpop.permute.xlu1 %387 }
 0x5fa   :  { %v1557_v30 = vadd.f32 %v388_v27, %v380_v26 }
 0x5fc   :  { %1287 = vtanh.f32 %v1557_v30 }
 0x602   :  { %v1288_v31 = vpop.eup %1287 }
 0x603   :  { %393 = vrot.lane.b32.xlu0 %v1288_v31, %s1382_s2 }
 0x619   :  { %v451_v29 = vpop.permute.xlu2 %450 }
 0x61a   :  { %v1562_v33 = vadd.f32 %v451_v29, %v443_v32 }
 0x61c   :  { %1289 = vtanh.f32 %v1562_v33 }
 0x622   :  { %v1290_v38 = vpop.eup %1289 }
 0x623   :  { %456 = vrot.lane.b32.xlu1 %v1290_v38, %s1382_s2 }
 0x675   :  { %v394_v39 = vpop.permute.xlu0 %393 }
 0x676   :  { %v396_v24 = vmul.f32 %v394_v39, %v377_v8 }
 0x678   :  { %v460_v40 = vpack.c.bf16 %v396_v24, %v396_v24  ;;  %519 = vrot.lane.b32.xlu0 %v396_v24, %s1383_s14 }
 0x67a   :  { %462 = vrot.lane.b32.xlu2 %v460_v40, %s1383_s14 }
 0x695   :  { %v457_v41 = vpop.permute.xlu1 %456 }
 0x696   :  { %v459_v42 = vmul.f32 %v457_v41, %v440_v23 }
 0x698   :  { %523 = vrot.lane.b32.xlu1 %v459_v42, %s1382_s2 }
 0x6d4   :  { %v463_v28 = vpop.permute.xlu2 %462 }
 0x6d5   :  { %1210 = vmatmul.msk.bf16.vlgmr.msrb.gmra.mxu3 %vm139_vm5, %v463_v28 }
 0x6d6   :  { %836 = vmatpush.bf16.msrb.mxu3 %v1436_v1 }
 0x6da   :  { %837 = vmatpush.bf16.msrb.mxu3 %v1445_v3 }
 0x6ea   :  { %v520_v43 = vpop.permute.xlu0 %519 }
 0x70a   :  { %v524_v44 = vpop.permute.xlu1 %523 }
 0x70b   :  { %v526_v45 = vsel %vm139_vm5, %v520_v43, %v524_v44 }
 0x70c   :  { %v527_v46 = vpack.c.bf16 %v526_v45, %v526_v45 }
 0x70e   :  { %1212 = vmatmul.msk.bf16.vlgmr.msra.gmra.mxu1 %vm285_vm6, %v527_v46 }
 0x70f   :  { %957 = vmatpush.bf16.msra.mxu1 %v1436_v1 }
 0x713   :  { %958 = vmatpush.bf16.msra.mxu1 %v1445_v3 }
 0x758   :  { %v476_v50 = vpop.f32.mrf.mxu3 }
 0x759   :  { %v480_v51 = vadd.f32 %v476_v50, %v102_v49 }
 0x75b   :  { %1291 = vtanh.f32 %v480_v51  ;;  %v1211_v56 = vmul.f32 -1.442695, %v480_v51 }
 0x760   :  { %v478_v52 = vpop.f32.mrf.mxu3 }
 0x761   :  { %v1292_v53 = vpop.eup %1291 }
 0x762   :  { %503 = vrot.lane.b32.xlu2 %v1292_v53, %s1382_s2 }
 0x78b   :  { %v540_v54 = vpop.f32.mrf.mxu1 }
 0x78c   :  { %v541_v55 = vadd.f32 %v1519_v48, %v540_v54 }
 0x78e   :  { %1293 = vtanh.f32 %v541_v55  ;;  %v1213_v10 = vmul.f32 -1.442695, %v541_v55 }
 0x78f   :  { %1295 = vpow2.f32 %v1211_v56 }
 0x793   :  { %v542_v57 = vpop.f32.mrf.mxu1 }
 0x794   :  { %v1294_v1 = vpop.eup %1293 }
 0x795   :  { %566 = vrot.lane.b32.xlu0 %v1294_v1, %s1382_s2  ;;  %v1296_v3 = vpop.eup %1295 }
 0x796   :  { %v484_v58 = vadd.f32 1.0, %v1296_v3 }
 0x798   :  { %1297 = vrcp.f32 %v484_v58  ;;  %v496_v0 = vand.u32 2147483648, %v484_v58  ;;  %vm490_vm11 = vweird.f32 %v484_v58  ;;  %v494_v2 = vand.u32 2147483647, %v484_v58 }
 0x799   :  { %1299 = vpow2.f32 %v1213_v10 }
 0x79a   :  { %v497_v6 = vor.u32 1.1754944e-38, %v496_v0  ;;  %vm495_vm13 = vcmp.eq.f32.partialorder %v494_v2, 8.507059e+37 }
 0x79e   :  { %v1298_v59 = vpop.eup %1297 }
 0x79f   :  { %v486_v60 = vmul.f32 %v1298_v59, %v484_v58  ;;  %vm491_vm10 = vweird.f32 %v1298_v59  ;;  %v1300_v11 = vpop.eup %1299 }
 0x7a0   :  { %vm492_vm12 = vmor %vm490_vm11, %vm491_vm10  ;;  %v547_v12 = vadd.f32 1.0, %v1300_v11 }
 0x7a1   :  { %v487_v61 = vsub.f32 1.0, %v486_v60 }
 0x7a2   :  { %1301 = vrcp.f32 %v547_v12  ;;  %v559_v18 = vand.u32 2147483648, %v547_v12  ;;  %vm553_vm15 = vweird.f32 %v547_v12  ;;  %v557_v19 = vand.u32 2147483647, %v547_v12 }
 0x7a3   :  { %v488_v62 = vmul.f32 %v1298_v59, %v487_v61 }
 0x7a4   :  { %v560_v21 = vor.u32 1.1754944e-38, %v559_v18  ;;  %vm558_vm2 = vcmp.eq.f32.partialorder %v557_v19, 8.507059e+37 }
 0x7a5   :  { %v489_v63 = vadd.f32 %v1298_v59, %v488_v62 }
 0x7a7   :  { %v493_v4 = vsel %vm492_vm12, %v1298_v59, %v489_v63 }
 0x7a8   :  { %v498_v8 = vsel %vm495_vm13, %v497_v6, %v493_v4  ;;  %v1302_v13 = vpop.eup %1301 }
 0x7a9   :  { %v549_v14 = vmul.f32 %v1302_v13, %v547_v12  ;;  %vm554_vm14 = vweird.f32 %v1302_v13  ;;  %v501_v26 = vmul.f32 %v498_v8, %v1557_v30 }
 0x7aa   :  { %vm555_vm1 = vmor %vm553_vm15, %vm554_vm14 }
 0x7ab   :  { %v550_v15 = vsub.f32 1.0, %v549_v14 }
 0x7ad   :  { %v551_v16 = vmul.f32 %v1302_v13, %v550_v15 }
 0x7af   :  { %v552_v17 = vadd.f32 %v1302_v13, %v551_v16 }
 0x7b1   :  { %v556_v20 = vsel %vm555_vm1, %v1302_v13, %v552_v17 }
 0x7b2   :  { %v561_v23 = vsel %vm558_vm2, %v560_v21, %v556_v20 }
 0x7b3   :  { %v564_v29 = vmul.f32 %v561_v23, %v1562_v33  ;;  %v1234_v33 = vld [vmem:[%s1724_s0 + $0x10] sm:$0xff] }
 0x7b4   :  { %1175 = vmatmul.msk.bf16.gmra.mxu0 %vm72_vm0, %v1234_v33 }
 0x7bc   :  { %v504_v7 = vpop.permute.xlu2 %503 }
 0x7bd   :  { %v506_v9 = vmul.f32 %v504_v7, %v498_v8 }
 0x7bf   :  { %508 = vrot.lane.b32.xlu1 %v506_v9, %s1383_s14 }
 0x807   :  { %v567_v22 = vpop.permute.xlu0 %566 }
 0x808   :  { %v569_v25 = vmul.f32 %v567_v22, %v561_v23 }
 0x80a   :  { %571 = vrot.lane.b32.xlu2 %v569_v25, %s1383_s14 }
 0x831   :  { %v509_v27 = vpop.permute.xlu1 %508  ;;  %v104_v49 = vpop.f32.mrf.mxu0 }
 0x832   :  { %v1583_v31 = vadd.f32 %v509_v27, %v501_v26  ;;  %v105_v50 = vadd.f32 %v1456_v5, %v104_v49 }
 0x834   :  { %1303 = vtanh.f32 %v1583_v31 }
 0x83a   :  { %v1304_v32 = vpop.eup %1303 }
 0x83b   :  { %514 = vrot.lane.b32.xlu0 %v1304_v32, %s1382_s2 }
 0x864   :  { %v572_v38 = vpop.permute.xlu2 %571 }
 0x865   :  { %v1588_v39 = vadd.f32 %v572_v38, %v564_v29 }
 0x867   :  { %1305 = vtanh.f32 %v1588_v39 }
 0x86d   :  { %v1306_v24 = vpop.eup %1305 }
 0x86e   :  { %577 = vrot.lane.b32.xlu1 %v1306_v24, %s1382_s2 }
 0x8ad   :  { %v515_v40 = vpop.permute.xlu0 %514 }
 0x8ae   :  { %v517_v30 = vmul.f32 %v515_v40, %v498_v8 }
 0x8b0   :  { %v581_v41 = vpack.c.bf16 %v517_v30, %v517_v30  ;;  %640 = vrot.lane.b32.xlu2 %v517_v30, %s1383_s14 }
 0x8b2   :  { %583 = vrot.lane.b32.xlu1 %v581_v41, %s1383_s14 }
 0x8e0   :  { %v578_v42 = vpop.permute.xlu1 %577 }
 0x8e1   :  { %v580_v28 = vmul.f32 %v578_v42, %v561_v23 }
 0x8e3   :  { %644 = vrot.lane.b32.xlu0 %v580_v28, %s1382_s2 }
 0x90a   :  { %v641_v44 = vpop.permute.xlu2 %640 }
 0x924   :  { %v584_v43 = vpop.permute.xlu1 %583 }
 0x925   :  { %1214 = vmatmul.msk.bf16.vlgmr.msra.gmra.mxu2 %vm139_vm5, %v584_v43 }
 0x926   :  { %1019 = vmatpush.bf16.msra.mxu2 %v1470_v34 }
 0x92a   :  { %1020 = vmatpush.bf16.msra.mxu2 %v1476_v35 }
 0x92e   :  { %1021 = vmatpush.bf16.msra.mxu2 %v1485_v36 }
 0x932   :  { %1022 = vmatpush.bf16.msra.mxu2 %v1497_v37 }
 0x955   :  { %v645_v45 = vpop.permute.xlu0 %644 }
 0x956   :  { %v647_v46 = vsel %vm139_vm5, %v641_v44, %v645_v45  ;;  %v106_v44 = vpop.f32.mrf.mxu0 }
 0x957   :  { %v648_v47 = vpack.c.bf16 %v647_v46, %v647_v46  ;;  %v107_v45 = vadd.f32 %v1456_v5, %v106_v44 }
 0x959   :  { %1216 = vmatmul.msk.bf16.vlgmr.msra.gmra.mxu3 %vm285_vm6, %v648_v47 }
 0x95a   :  { %1082 = vmatpush.bf16.msra.mxu3 %v1470_v34 }
 0x95e   :  { %1083 = vmatpush.bf16.msra.mxu3 %v1476_v35 }
 0x962   :  { %1084 = vmatpush.bf16.msra.mxu3 %v1485_v36 }
 0x966   :  { %1085 = vmatpush.bf16.msra.mxu3 %v1497_v37 }
 0x9a8   :  { %v597_v51 = vpop.f32.mrf.mxu2 }
 0x9a9   :  { %v601_v52 = vadd.f32 %v597_v51, %v105_v50 }
 0x9ab   :  { %1307 = vtanh.f32 %v601_v52  ;;  %v1215_v34 = vmul.f32 -1.442695, %v601_v52 }
 0x9b0   :  { %v599_v53 = vpop.f32.mrf.mxu2 }
 0x9b1   :  { %v1308_v54 = vpop.eup %1307 }
 0x9b2   :  { %624 = vrot.lane.b32.xlu2 %v1308_v54, %s1382_s2 }
 0x9dc   :  { %v661_v55 = vpop.f32.mrf.mxu3 }
 0x9dd   :  { %v662_v56 = vadd.f32 %v1519_v48, %v661_v55 }
 0x9df   :  { %1309 = vtanh.f32 %v662_v56  ;;  %v1217_v7 = vmul.f32 -1.442695, %v662_v56 }
 0x9e0   :  { %1311 = vpow2.f32 %v1215_v34 }
 0x9e4   :  { %v663_v35 = vpop.f32.mrf.mxu3 }
 0x9e5   :  { %v1310_v36 = vpop.eup %1309 }
 0x9e6   :  { %687 = vrot.lane.b32.xlu0 %v1310_v36, %s1382_s2  ;;  %v1312_v37 = vpop.eup %1311 }
 0x9e7   :  { %v605_v57 = vadd.f32 1.0, %v1312_v37 }
 0x9e9   :  { %1313 = vrcp.f32 %v605_v57  ;;  %v617_v61 = vand.u32 2147483648, %v605_v57  ;;  %vm611_vm4 = vweird.f32 %v605_v57  ;;  %v615_v62 = vand.u32 2147483647, %v605_v57 }
 0x9ea   :  { %1315 = vpow2.f32 %v1217_v7 }
 0x9eb   :  { %v618_v0 = vor.u32 1.1754944e-38, %v617_v61  ;;  %vm616_vm8 = vcmp.eq.f32.partialorder %v615_v62, 8.507059e+37 }
 0x9ef   :  { %v1314_v1 = vpop.eup %1313 }
 0x9f0   :  { %v607_v3 = vmul.f32 %v1314_v1, %v605_v57  ;;  %vm612_vm3 = vweird.f32 %v1314_v1  ;;  %v1316_v8 = vpop.eup %1315 }
 0x9f1   :  { %vm613_vm7 = vmor %vm611_vm4, %vm612_vm3  ;;  %v668_v9 = vadd.f32 1.0, %v1316_v8 }
 0x9f2   :  { %v608_v58 = vsub.f32 1.0, %v607_v3 }
 0x9f3   :  { %1317 = vrcp.f32 %v668_v9  ;;  %v680_v15 = vand.u32 2147483648, %v668_v9  ;;  %vm674_vm10 = vweird.f32 %v668_v9  ;;  %v678_v16 = vand.u32 2147483647, %v668_v9 }
 0x9f4   :  { %v609_v59 = vmul.f32 %v1314_v1, %v608_v58 }
 0x9f5   :  { %v681_v18 = vor.u32 1.1754944e-38, %v680_v15  ;;  %vm679_vm12 = vcmp.eq.f32.partialorder %v678_v16, 8.507059e+37 }
 0x9f6   :  { %v610_v60 = vadd.f32 %v1314_v1, %v609_v59 }
 0x9f8   :  { %v614_v63 = vsel %vm613_vm7, %v1314_v1, %v610_v60 }
 0x9f9   :  { %v619_v4 = vsel %vm616_vm8, %v618_v0, %v614_v63  ;;  %v1318_v10 = vpop.eup %1317 }
 0x9fa   :  { %v670_v11 = vmul.f32 %v1318_v10, %v668_v9  ;;  %vm675_vm9 = vweird.f32 %v1318_v10  ;;  %v622_v22 = vmul.f32 %v619_v4, %v1583_v31 }
 0x9fb   :  { %vm676_vm11 = vmor %vm674_vm10, %vm675_vm9 }
 0x9fc   :  { %v671_v12 = vsub.f32 1.0, %v670_v11 }
 0x9fe   :  { %v672_v13 = vmul.f32 %v1318_v10, %v671_v12 }
 0xa00   :  { %v673_v14 = vadd.f32 %v1318_v10, %v672_v13 }
 0xa02   :  { %v677_v17 = vsel %vm676_vm11, %v1318_v10, %v673_v14 }
 0xa03   :  { %v682_v20 = vsel %vm679_vm12, %v681_v18, %v677_v17 }
 0xa04   :  { %v685_v27 = vmul.f32 %v682_v20, %v1588_v39 }
 0xa0c   :  { %v625_v2 = vpop.permute.xlu2 %624 }
 0xa0d   :  { %v627_v6 = vmul.f32 %v625_v2, %v619_v4 }
 0xa0f   :  { %629 = vrot.lane.b32.xlu1 %v627_v6, %s1383_s14 }
 0xa58   :  { %v688_v19 = vpop.permute.xlu0 %687 }
 0xa59   :  { %v690_v21 = vmul.f32 %v688_v19, %v682_v20 }
 0xa5b   :  { %692 = vrot.lane.b32.xlu2 %v690_v21, %s1383_s14 }
 0xa81   :  { %v630_v23 = vpop.permute.xlu1 %629 }
 0xa82   :  { %v1617_v25 = vadd.f32 %v630_v23, %v622_v22 }
 0xa84   :  { %1319 = vtanh.f32 %v1617_v25 }
 0xa8a   :  { %v1320_v26 = vpop.eup %1319 }
 0xa8b   :  { %635 = vrot.lane.b32.xlu0 %v1320_v26, %s1382_s2 }
 0xab5   :  { %v693_v32 = vpop.permute.xlu2 %692 }
 0xab6   :  { %v1622_v29 = vadd.f32 %v693_v32, %v685_v27 }
 0xab8   :  { %1321 = vtanh.f32 %v1622_v29 }
 0xabe   :  { %v1322_v38 = vpop.eup %1321 }
 0xabf   :  { %698 = vrot.lane.b32.xlu1 %v1322_v38, %s1382_s2 }
 0xafd   :  { %v636_v24 = vpop.permute.xlu0 %635 }
 0xafe   :  { %v638_v31 = vmul.f32 %v636_v24, %v619_v4 }
 0xb00   :  { %v702_v40 = vpack.c.bf16 %v638_v31, %v638_v31  ;;  %761 = vrot.lane.b32.xlu2 %v638_v31, %s1383_s14 }
 0xb02   :  { %704 = vrot.lane.b32.xlu1 %v702_v40, %s1383_s14 }
 0xb31   :  { %v699_v30 = vpop.permute.xlu1 %698 }
 0xb32   :  { %v701_v41 = vmul.f32 %v699_v30, %v682_v20 }
 0xb34   :  { %765 = vrot.lane.b32.xlu0 %v701_v41, %s1382_s2 }
 0xb5a   :  { %v762_v42 = vpop.permute.xlu2 %761 }
 0xb74   :  { %v705_v39 = vpop.permute.xlu1 %704 }
 0xb75   :  { %1218 = vmatmul.msk.bf16.vlgmr.msrb.gmra.mxu1 %vm139_vm5, %v705_v39 }
 0xba6   :  { %v766_v28 = vpop.permute.xlu0 %765 }
 0xba7   :  { %v768_v33 = vsel %vm139_vm5, %v762_v42, %v766_v28  ;;  %v1661_v28 = vld [vmem:[%s1725_s3] ss:$0 sm:$0xff] }
 0xba8   :  { %v769_v43 = vpack.c.bf16 %v768_v33, %v768_v33 }
 0xbaa   :  { %1220 = vmatmul.msk.bf16.vlgmr.msrb.gmra.mxu2 %vm285_vm6, %v769_v43 }
 0xbf2   :  { %v718_v46 = vpop.f32.mrf.mxu1 }
 0xbf3   :  { %v722_v47 = vadd.f32 %v718_v46, %v107_v45 }
 0xbf5   :  { %1323 = vtanh.f32 %v722_v47  ;;  %v1219_v51 = vmul.f32 -1.442695, %v722_v47 }
 0xbf7   :  { %1325 = vpow2.f32 %v1219_v51 }
 0xbfa   :  { %v720_v49 = vpop.f32.mrf.mxu1 }
 0xbfb   :  { %v1324_v50 = vpop.eup %1323 }
 0xbfc   :  { %745 = vrot.lane.b32.xlu2 %v1324_v50, %s1382_s2 }
 0xbfd   :  { %v1326_v54 = vpop.eup %1325 }
 0xbfe   :  { %v726_v34 = vadd.f32 1.0, %v1326_v54 }
 0xc00   :  { %v738_v1 = vand.u32 2147483648, %v726_v34  ;;  %vm732_vm14 = vweird.f32 %v726_v34  ;;  %v736_v3 = vand.u32 2147483647, %v726_v34 }
 0xc02   :  { %v739_v59 = vor.u32 1.1754944e-38, %v738_v1  ;;  %vm737_vm1 = vcmp.eq.f32.partialorder %v736_v3, 8.507059e+37 }
 0xc2d   :  { %v782_v52 = vpop.f32.mrf.mxu2 }
 0xc2e   :  { %v783_v53 = vadd.f32 %v1519_v48, %v782_v52 }
 0xc30   :  { %1327 = vtanh.f32 %v783_v53  ;;  %v1221_v63 = vmul.f32 -1.442695, %v783_v53 }
 0xc31   :  { %1329 = vrcp.f32 %v726_v34 }
 0xc32   :  { %1331 = vpow2.f32 %v1221_v63 }
 0xc35   :  { %v784_v55 = vpop.f32.mrf.mxu2 }
 0xc36   :  { %v1328_v56 = vpop.eup %1327 }
 0xc37   :  { %808 = vrot.lane.b32.xlu0 %v1328_v56, %s1382_s2  ;;  %v1330_v5 = vpop.eup %1329 }
 0xc38   :  { %v728_v35 = vmul.f32 %v1330_v5, %v726_v34  ;;  %vm733_vm13 = vweird.f32 %v1330_v5  ;;  %v1332_v0 = vpop.eup %1331 }
 0xc39   :  { %vm734_vm15 = vmor %vm732_vm14, %vm733_vm13  ;;  %v789_v2 = vadd.f32 1.0, %v1332_v0 }
 0xc3a   :  { %v729_v36 = vsub.f32 1.0, %v728_v35 }
 0xc3b   :  { %1333 = vrcp.f32 %v789_v2  ;;  %v801_v10 = vand.u32 2147483648, %v789_v2  ;;  %vm795_vm3 = vweird.f32 %v789_v2  ;;  %v799_v11 = vand.u32 2147483647, %v789_v2 }
 0xc3c   :  { %v730_v37 = vmul.f32 %v1330_v5, %v729_v36 }
 0xc3d   :  { %v802_v13 = vor.u32 1.1754944e-38, %v801_v10  ;;  %vm800_vm7 = vcmp.eq.f32.partialorder %v799_v11, 8.507059e+37 }
 0xc3e   :  { %v731_v57 = vadd.f32 %v1330_v5, %v730_v37 }
 0xc40   :  { %v735_v58 = vsel %vm734_vm15, %v1330_v5, %v731_v57 }
 0xc41   :  { %v740_v61 = vsel %vm737_vm1, %v739_v59, %v735_v58  ;;  %v1334_v4 = vpop.eup %1333 }
 0xc42   :  { %v791_v6 = vmul.f32 %v1334_v4, %v789_v2  ;;  %vm796_vm2 = vweird.f32 %v1334_v4  ;;  %v743_v17 = vmul.f32 %v740_v61, %v1617_v25 }
 0xc43   :  { %vm797_vm4 = vmor %vm795_vm3, %vm796_vm2 }
 0xc44   :  { %v792_v7 = vsub.f32 1.0, %v791_v6 }
 0xc46   :  { %v793_v8 = vmul.f32 %v1334_v4, %v792_v7 }
 0xc48   :  { %v794_v9 = vadd.f32 %v1334_v4, %v793_v8 }
 0xc4a   :  { %v798_v12 = vsel %vm797_vm4, %v1334_v4, %v794_v9 }
 0xc4b   :  { %v803_v15 = vsel %vm800_vm7, %v802_v13, %v798_v12 }
 0xc4c   :  { %v806_v21 = vmul.f32 %v803_v15, %v1622_v29  ;;  %v1235_v29 = vld [vmem:[%s1724_s0 + $0x18] sm:$0xff] }
 0xc4d   :  { %1176 = vmatmul.msk.bf16.gmra.mxu0 %vm72_vm0, %v1235_v29 }
 0xc56   :  { %v746_v60 = vpop.permute.xlu2 %745 }
 0xc57   :  { %v748_v62 = vmul.f32 %v746_v60, %v740_v61 }
 0xc59   :  { %750 = vrot.lane.b32.xlu1 %v748_v62, %s1383_s14 }
 0xca9   :  { %v809_v14 = vpop.permute.xlu0 %808 }
 0xcaa   :  { %v811_v16 = vmul.f32 %v809_v14, %v803_v15 }
 0xcac   :  { %813 = vrot.lane.b32.xlu2 %v811_v16, %s1383_s14 }
 0xcca   :  { %v109_v42 = vpop.f32.mrf.mxu0 }
 0xccb   :  { %v751_v18 = vpop.permute.xlu1 %750  ;;  %v110_v33 = vadd.f32 %v1661_v28, %v109_v42 }
 0xccc   :  { %v1639_v19 = vadd.f32 %v751_v18, %v743_v17 }
 0xcce   :  { %1335 = vtanh.f32 %v1639_v19 }
 0xcd2   :  { %v1665_v51 = vpop.f32.mrf.mxu0 }
 0xcd4   :  { %v1336_v20 = vpop.eup %1335 }
 0xcd5   :  { %756 = vrot.lane.b32.xlu0 %v1336_v20, %s1382_s2 }
 0xd06   :  { %v814_v22 = vpop.permute.xlu2 %813 }
 0xd07   :  { %v1644_v23 = vadd.f32 %v814_v22, %v806_v21 }
 0xd09   :  { %1337 = vtanh.f32 %v1644_v23 }
 0xd0f   :  { %v1338_v26 = vpop.eup %1337 }
 0xd10   :  { %819 = vrot.lane.b32.xlu1 %v1338_v26, %s1382_s2 }
 0xd47   :  { %v757_v27 = vpop.permute.xlu0 %756 }
 0xd48   :  { %v759_v25 = vmul.f32 %v757_v27, %v740_v61 }
 0xd4a   :  { %v823_v32 = vpack.c.bf16 %v759_v25, %v759_v25  ;;  %882 = vrot.lane.b32.xlu0 %v759_v25, %s1383_s14 }
 0xd4c   :  { %825 = vrot.lane.b32.xlu2 %v823_v32, %s1383_s14 }
 0xd82   :  { %v820_v38 = vpop.permute.xlu1 %819 }
 0xd83   :  { %v822_v24 = vmul.f32 %v820_v38, %v803_v15 }
 0xd85   :  { %886 = vrot.lane.b32.xlu1 %v822_v24, %s1382_s2 }
 0xda6   :  { %v826_v31 = vpop.permute.xlu2 %825 }
 0xda7   :  { %1222 = vmatmul.msk.bf16.vlgmr.msrb.gmra.mxu3 %vm139_vm5, %v826_v31 }
 0xdbc   :  { %v883_v40 = vpop.permute.xlu0 %882 }
 0xdf7   :  { %v887_v30 = vpop.permute.xlu1 %886 }
 0xdf8   :  { %v889_v41 = vsel %vm139_vm5, %v883_v40, %v887_v30  ;;  %v112_v40 = vadd.f32 %v1661_v28, %v1665_v51  ;;  %v1693_v28 = vld [vmem:[%s1727_s5] ss:$0 sm:$0xff] }
 0xdf9   :  { %v890_v39 = vpack.c.bf16 %v889_v41, %v889_v41 }
 0xdfb   :  { %1224 = vmatmul.msk.bf16.vlgmr.msrb.gmra.mxu0 %vm285_vm6, %v890_v39 }
 0xe2a   :  { %v839_v43 = vpop.f32.mrf.mxu3 }
 0xe2b   :  { %v843_v44 = vadd.f32 %v839_v43, %v110_v33 }
 0xe2d   :  { %1339 = vtanh.f32 %v843_v44  ;;  %v1223_v47 = vmul.f32 -1.442695, %v843_v44 }
 0xe2f   :  { %1341 = vpow2.f32 %v1223_v47 }
 0xe32   :  { %v841_v45 = vpop.f32.mrf.mxu3 }
 0xe33   :  { %v1340_v46 = vpop.eup %1339 }
 0xe34   :  { %866 = vrot.lane.b32.xlu2 %v1340_v46, %s1382_s2 }
 0xe35   :  { %v1342_v49 = vpop.eup %1341 }
 0xe36   :  { %v847_v50 = vadd.f32 1.0, %v1342_v49 }
 0xe38   :  { %1343 = vrcp.f32 %v847_v50  ;;  %v859_v37 = vand.u32 2147483648, %v847_v50  ;;  %vm853_vm8 = vweird.f32 %v847_v50  ;;  %v857_v57 = vand.u32 2147483647, %v847_v50 }
 0xe3a   :  { %v860_v3 = vor.u32 1.1754944e-38, %v859_v37  ;;  %vm858_vm10 = vcmp.eq.f32.partialorder %v857_v57, 8.507059e+37 }
 0xe3e   :  { %v1344_v52 = vpop.eup %1343 }
 0xe3f   :  { %v849_v55 = vmul.f32 %v1344_v52, %v847_v50  ;;  %vm854_vm0 = vweird.f32 %v1344_v52 }
 0xe40   :  { %vm855_vm9 = vmor %vm853_vm8, %vm854_vm0 }
 0xe41   :  { %v850_v56 = vsub.f32 1.0, %v849_v55 }
 0xe43   :  { %v851_v35 = vmul.f32 %v1344_v52, %v850_v56 }
 0xe45   :  { %v852_v36 = vadd.f32 %v1344_v52, %v851_v35 }
 0xe47   :  { %v856_v1 = vsel %vm855_vm9, %v1344_v52, %v852_v36 }
 0xe48   :  { %v861_v59 = vsel %vm858_vm10, %v860_v3, %v856_v1 }
 0xe49   :  { %v864_v14 = vmul.f32 %v861_v59, %v1639_v19 }
 0xe78   :  { %v903_v53 = vpop.f32.mrf.mxu0 }
 0xe79   :  { %v904_v54 = vadd.f32 %v1519_v48, %v903_v53 }
 0xe7b   :  { %1345 = vtanh.f32 %v904_v54  ;;  %v1225_v60 = vmul.f32 -1.442695, %v904_v54 }
 0xe7d   :  { %1347 = vpow2.f32 %v1225_v60 }
 0xe80   :  { %v905_v34 = vpop.f32.mrf.mxu0 }
 0xe81   :  { %v1346_v5 = vpop.eup %1345 }
 0xe82   :  { %929 = vrot.lane.b32.xlu0 %v1346_v5, %s1382_s2 }
 0xe83   :  { %v1348_v61 = vpop.eup %1347 }
 0xe84   :  { %v910_v62 = vadd.f32 1.0, %v1348_v61 }
 0xe86   :  { %1349 = vrcp.f32 %v910_v62  ;;  %v922_v7 = vand.u32 2147483648, %v910_v62  ;;  %vm916_vm12 = vweird.f32 %v910_v62  ;;  %v920_v8 = vand.u32 2147483647, %v910_v62 }
 0xe88   :  { %v923_v10 = vor.u32 1.1754944e-38, %v922_v7  ;;  %vm921_vm14 = vcmp.eq.f32.partialorder %v920_v8, 8.507059e+37 }
 0xe8c   :  { %v1350_v63 = vpop.eup %1349 }
 0xe8d   :  { %v912_v0 = vmul.f32 %v1350_v63, %v910_v62  ;;  %vm917_vm11 = vweird.f32 %v1350_v63 }
 0xe8e   :  { %v867_v58 = vpop.permute.xlu2 %866  ;;  %vm918_vm13 = vmor %vm916_vm12, %vm917_vm11  ;;  %vm1147_vm12 = vcmask 7168  }
 0xe8f   :  { %v869_v48 = vmul.f32 %v867_v58, %v861_v59  ;;  %v913_v2 = vsub.f32 1.0, %v912_v0 }
 0xe91   :  { %871 = vrot.lane.b32.xlu1 %v869_v48, %s1383_s14  ;;  %v914_v4 = vmul.f32 %v1350_v63, %v913_v2 }
 0xe93   :  { %v915_v6 = vadd.f32 %v1350_v63, %v914_v4 }
 0xe95   :  { %v919_v9 = vsel %vm918_vm13, %v1350_v63, %v915_v6 }
 0xe96   :  { %v924_v12 = vsel %vm921_vm14, %v923_v10, %v919_v9 }
 0xe97   :  { %v927_v18 = vmul.f32 %v924_v12, %v1644_v23 }
 0xef4   :  { %v930_v11 = vpop.permute.xlu0 %929 }
 0xef5   :  { %v932_v13 = vmul.f32 %v930_v11, %v924_v12 }
 0xef7   :  { %934 = vrot.lane.b32.xlu2 %v932_v13, %s1383_s14 }
 0xf03   :  { %v872_v15 = vpop.permute.xlu1 %871 }
 0xf04   :  { %v1672_v16 = vadd.f32 %v872_v15, %v864_v14 }
 0xf06   :  { %1351 = vtanh.f32 %v1672_v16 }
 0xf0c   :  { %v1352_v17 = vpop.eup %1351 }
 0xf0d   :  { %877 = vrot.lane.b32.xlu0 %v1352_v17, %s1382_s2 }
 0xf51   :  { %v935_v20 = vpop.permute.xlu2 %934 }
 0xf52   :  { %v1677_v21 = vadd.f32 %v935_v20, %v927_v18 }
 0xf54   :  { %1353 = vtanh.f32 %v1677_v21 }
 0xf5a   :  { %v1354_v22 = vpop.eup %1353 }
 0xf5b   :  { %940 = vrot.lane.b32.xlu1 %v1354_v22, %s1382_s2 }
 0xf7f   :  { %v878_v26 = vpop.permute.xlu0 %877 }
 0xf80   :  { %v880_v19 = vmul.f32 %v878_v26, %v861_v59 }
 0xf82   :  { %v944_v27 = vpack.c.bf16 %v880_v19, %v880_v19  ;;  %1003 = vrot.lane.b32.xlu2 %v880_v19, %s1383_s14 }
 0xf84   :  { %946 = vrot.lane.b32.xlu1 %v944_v27, %s1383_s14 }
 0xfcd   :  { %v941_v25 = vpop.permute.xlu1 %940 }
 0xfce   :  { %v943_v32 = vmul.f32 %v941_v25, %v924_v12 }
 0xfd0   :  { %1007 = vrot.lane.b32.xlu0 %v943_v32, %s1382_s2 }
 0xfdc   :  { %v1004_v38 = vpop.permute.xlu2 %1003 }
 0xff6   :  { %v947_v23 = vpop.permute.xlu1 %946 }
 0xff7   :  { %1226 = vmatmul.msk.bf16.vlgmr.msra.gmra.mxu1 %vm139_vm5, %v947_v23 }
0x1042   :  { %v1008_v24 = vpop.permute.xlu0 %1007 }
0x1043   :  { %v1010_v29 = vsel %vm139_vm5, %v1004_v38, %v1008_v24 }
0x1044   :  { %v1011_v31 = vpack.c.bf16 %v1010_v29, %v1010_v29 }
0x1046   :  { %1228 = vmatmul.msk.bf16.vlgmr.msra.gmra.mxu2 %vm285_vm6, %v1011_v31 }
0x1074   :  { %v960_v30 = vpop.f32.mrf.mxu1 }
0x1075   :  { %v964_v41 = vadd.f32 %v960_v30, %v112_v40 }
0x1077   :  { %1355 = vtanh.f32 %v964_v41  ;;  %v1227_v33 = vmul.f32 -1.442695, %v964_v41 }
0x1079   :  { %1357 = vpow2.f32 %v1227_v33 }
0x107c   :  { %v962_v39 = vpop.f32.mrf.mxu1 }
0x107d   :  { %v1356_v42 = vpop.eup %1355 }
0x107e   :  { %987 = vrot.lane.b32.xlu2 %v1356_v42, %s1382_s2 }
0x107f   :  { %v1358_v43 = vpop.eup %1357 }
0x1080   :  { %v968_v44 = vadd.f32 1.0, %v1358_v43 }
0x1082   :  { %1359 = vrcp.f32 %v968_v44  ;;  %v980_v55 = vand.u32 2147483648, %v968_v44  ;;  %vm974_vm1 = vweird.f32 %v968_v44  ;;  %v978_v56 = vand.u32 2147483647, %v968_v44 }
0x1084   :  { %v981_v5 = vor.u32 1.1754944e-38, %v980_v55  ;;  %vm979_vm3 = vcmp.eq.f32.partialorder %v978_v56, 8.507059e+37 }
0x1088   :  { %v1360_v45 = vpop.eup %1359 }
0x1089   :  { %v970_v46 = vmul.f32 %v1360_v45, %v968_v44  ;;  %vm975_vm15 = vweird.f32 %v1360_v45 }
0x108a   :  { %vm976_vm2 = vmor %vm974_vm1, %vm975_vm15 }
0x108b   :  { %v971_v49 = vsub.f32 1.0, %v970_v46 }
0x108d   :  { %v972_v51 = vmul.f32 %v1360_v45, %v971_v49  ;;  %v1249_v49 = vld [vmem:[%s1728_s6] ss:$0 sm:$0xff] }
0x108f   :  { %v973_v53 = vadd.f32 %v1360_v45, %v972_v51 }
0x1091   :  { %v977_v34 = vsel %vm976_vm2, %v1360_v45, %v973_v53 }
0x1092   :  { %v982_v36 = vsel %vm979_vm3, %v981_v5, %v977_v34  ;;  %v13_v34 = vstv %s1729_s7 }
0x1093   :  { %v985_v8 = vmul.f32 %v982_v36, %v1672_v16  ;;  %14 = vst [vmem:[#allocation2] sm:$0x1] %v13_v34 }
0x10c9   :  { %v1024_v47 = vpop.f32.mrf.mxu2 }
0x10ca   :  { %v1025_v50 = vadd.f32 %v1693_v28, %v1024_v47 }
0x10cc   :  { %1361 = vtanh.f32 %v1025_v50  ;;  %v1229_v57 = vmul.f32 -1.442695, %v1025_v50 }
0x10ce   :  { %1363 = vpow2.f32 %v1229_v57 }
0x10d1   :  { %v1026_v52 = vpop.f32.mrf.mxu2 }
0x10d2   :  { %v1362_v54 = vpop.eup %1361 }
0x10d3   :  { %1050 = vrot.lane.b32.xlu0 %v1362_v54, %s1382_s2 }
0x10d4   :  { %v1364_v1 = vpop.eup %1363 }
0x10d5   :  { %v1031_v3 = vadd.f32 1.0, %v1364_v1 }
0x10d7   :  { %1365 = vrcp.f32 %v1031_v3  ;;  %v1043_v62 = vand.u32 2147483648, %v1031_v3  ;;  %vm1037_vm7 = vweird.f32 %v1031_v3  ;;  %v1041_v63 = vand.u32 2147483647, %v1031_v3 }
0x10d8   :  { %v988_v35 = vpop.permute.xlu2 %987 }
0x10d9   :  { %v990_v37 = vmul.f32 %v988_v35, %v982_v36  ;;  %v1044_v2 = vor.u32 1.1754944e-38, %v1043_v62  ;;  %vm1042_vm8 = vcmp.eq.f32.partialorder %v1041_v63, 8.507059e+37 }
0x10db   :  { %992 = vrot.lane.b32.xlu1 %v990_v37, %s1383_s14 }
0x10dd   :  { %v1366_v58 = vpop.eup %1365 }
0x10de   :  { %v1033_v59 = vmul.f32 %v1366_v58, %v1031_v3  ;;  %vm1038_vm4 = vweird.f32 %v1366_v58 }
0x10df   :  { %vm1039_vm0 = vmor %vm1037_vm7, %vm1038_vm4 }
0x10e0   :  { %v1034_v48 = vsub.f32 1.0, %v1033_v59 }
0x10e2   :  { %v1035_v60 = vmul.f32 %v1366_v58, %v1034_v48 }
0x10e4   :  { %v1036_v61 = vadd.f32 %v1366_v58, %v1035_v60 }
0x10e6   :  { %v1040_v0 = vsel %vm1039_vm0, %v1366_v58, %v1036_v61 }
0x10e7   :  { %v1045_v6 = vsel %vm1042_vm8, %v1044_v2, %v1040_v0 }
0x10e8   :  { %v1048_v12 = vmul.f32 %v1045_v6, %v1677_v21 }
0x1145   :  { %v1051_v4 = vpop.permute.xlu0 %1050 }
0x1146   :  { %v1053_v7 = vmul.f32 %v1051_v4, %v1045_v6 }
0x1148   :  { %1055 = vrot.lane.b32.xlu2 %v1053_v7, %s1383_s14 }
0x114d   :  { %v993_v9 = vpop.permute.xlu1 %992 }
0x114e   :  { %v995_v10 = vadd.f32 %v993_v9, %v985_v8 }
0x1150   :  { %1367 = vtanh.f32 %v995_v10 }
0x1156   :  { %v1368_v11 = vpop.eup %1367 }
0x1157   :  { %998 = vrot.lane.b32.xlu0 %v1368_v11, %s1382_s2 }
0x11a2   :  { %v1056_v13 = vpop.permute.xlu2 %1055 }
0x11a3   :  { %v1058_v14 = vadd.f32 %v1056_v13, %v1048_v12 }
0x11a5   :  { %1369 = vtanh.f32 %v1058_v14 }
0x11ab   :  { %v1370_v15 = vpop.eup %1369 }
0x11ac   :  { %1061 = vrot.lane.b32.xlu1 %v1370_v15, %s1382_s2 }
0x11c9   :  { %v999_v17 = vpop.permute.xlu0 %998 }
0x11ca   :  { %v1001_v18 = vmul.f32 %v999_v17, %v982_v36  ;;  %v1250_v36 = vld [vmem:[#allocation2] ss:$0 sm:$0xff] }
0x11cc   :  { %1066 = vrot.lane.b32.xlu2 %v1001_v18, %s1383_s14 }
0x121e   :  { %v1062_v20 = vpop.permute.xlu1 %1061 }
0x121f   :  { %v1064_v16 = vmul.f32 %v1062_v20, %v1045_v6 }
0x1221   :  { %1070 = vrot.lane.b32.xlu0 %v1064_v16, %s1382_s2 }
0x1226   :  { %v1067_v22 = vpop.permute.xlu2 %1066 }
0x1293   :  { %v1071_v26 = vpop.permute.xlu0 %1070 }
0x1294   :  { %v1073_v19 = vsel %vm139_vm5, %v1067_v22, %v1071_v26 }
0x1295   :  { %v1074_v27 = vpack.c.bf16 %v1073_v19, %v1073_v19 }
0x1297   :  { %1230 = vmatmul.msk.bf16.vlgmr.msra.gmra.mxu3 %vm285_vm6, %v1074_v27 }
0x131a   :  { %v1087_v21 = vpop.f32.mrf.mxu3 }
0x131b   :  { %v1088_v25 = vadd.f32 %v1693_v28, %v1087_v21 }
0x131d   :  { %1371 = vtanh.f32 %v1088_v25  ;;  %v1231_v38 = vmul.f32 -1.442695, %v1088_v25 }
0x131f   :  { %1373 = vpow2.f32 %v1231_v38 }
0x1322   :  { %v1089_v32 = vpop.f32.mrf.mxu3 }
0x1323   :  { %v1372_v23 = vpop.eup %1371 }
0x1324   :  { %1113 = vrot.lane.b32.xlu1 %v1372_v23, %s1382_s2 }
0x1325   :  { %v1374_v24 = vpop.eup %1373 }
0x1326   :  { %v1094_v29 = vadd.f32 1.0, %v1374_v24 }
0x1328   :  { %1375 = vrcp.f32 %v1094_v29  ;;  %v1106_v42 = vand.u32 2147483648, %v1094_v29  ;;  %vm1100_vm6 = vweird.f32 %v1094_v29  ;;  %v1104_v33 = vand.u32 2147483647, %v1094_v29 }
0x132a   :  { %v1107_v44 = vor.u32 1.1754944e-38, %v1106_v42  ;;  %vm1105_vm11 = vcmp.eq.f32.partialorder %v1104_v33, 8.507059e+37 }
0x132c   :  { %1131 = vrot.lane.b32.xlu1 %v1249_v49, %s1384_s11 }
0x132e   :  { %v1376_v31 = vpop.eup %1375 }
0x132f   :  { %v1096_v40 = vmul.f32 %v1376_v31, %v1094_v29  ;;  %vm1101_vm9 = vweird.f32 %v1376_v31 }
0x1330   :  { %vm1102_vm10 = vmor %vm1100_vm6, %vm1101_vm9 }
0x1331   :  { %v1097_v30 = vsub.f32 1.0, %v1096_v40 }
0x1333   :  { %v1098_v41 = vmul.f32 %v1376_v31, %v1097_v30 }
0x1335   :  { %v1099_v39 = vadd.f32 %v1376_v31, %v1098_v41 }
0x1337   :  { %v1103_v43 = vsel %vm1102_vm10, %v1376_v31, %v1099_v39 }
0x1338   :  { %v1108_v46 = vsel %vm1105_vm11, %v1107_v44, %v1103_v43 }
0x1339   :  { %v1111_v28 = vmul.f32 %v1108_v46, %v1058_v14 }
0x1396   :  { %v1114_v45 = vpop.permute.xlu1 %1113 }
0x1397   :  { %v1116_v47 = vmul.f32 %v1114_v45, %v1108_v46 }
0x1399   :  { %1118 = vrot.lane.b32.xlu2 %v1116_v47, %s1383_s14 }
0x139e   :  { %v1132_v54 = vpop.permute.xlu1 %1131 }
0x13f3   :  { %v1119_v50 = vpop.permute.xlu2 %1118 }
0x13f4   :  { %v1121_v51 = vadd.f32 %v1119_v50, %v1111_v28 }
0x13f6   :  { %1377 = vtanh.f32 %v1121_v51 }
0x13fc   :  { %v1378_v52 = vpop.eup %1377 }
0x13fd   :  { %1124 = vrot.lane.b32.xlu0 %v1378_v52, %s1382_s2 }
0x146f   :  { %v1125_v53 = vpop.permute.xlu0 %1124 }
0x1470   :  { %v1127_v55 = vmul.f32 %v1125_v53, %v1108_v46 }
0x1472   :  { %v1134_v56 = vmul.f32 %v1132_v54, %v1127_v55 }
0x1474   :  { %1136 = vrot.lane.b32.xlu2 %v1134_v56, %s1383_s14 }
0x14ce   :  { %v1137_v5 = vpop.permute.xlu2 %1136 }
0x14cf   :  { %v1139_v35 = vsel %vm139_vm5, %v1137_v5, 0.0 }
0x14d0   :  { %1140 = vadd.xlane.f32.xlu0 %v1139_v35 }
0x1543   :  { %v1141_v37 = vpop.xlane.xlu0 %1140 }
0x1544   :  { %v1146_v57 = vadd.f32 %v1250_v36, %v1141_v37 }
0x1546   :  { %1148 = vst.msk [vmem:[%s1730_s8] sm:$0xff] %vm1147_vm12, %v1146_v57 }

</bundles_post_ra>
